<compile_context>
chip_gen: v6e
topology: v6e:2x2x1
jax: 0.10.0
libtpu: 0.0.40
codegen_flags: <defaults>
</compile_context>

<pallas_src>
import functools

import jax
import jax.numpy as jnp
from jax.experimental import pallas as pl
from jax.experimental.pallas import tpu as pltpu


def _layer_norm(z, gamma, beta, eps=1e-5):
    mu = jnp.mean(z, axis=-1, keepdims=True)
    var = jnp.mean((z - mu) ** 2, axis=-1, keepdims=True)
    return (z - mu) * jax.lax.rsqrt(var + eps) * gamma + beta


def _vmem_limit_bytes():
    # v5e/v6e have 128 MiB physical VMEM, v7x has 64 MiB per TensorCore; leave
    # headroom for Mosaic's own scratch so weight double-buffering still fits.
    phys = 128 * 1024 * 1024
    try:
        phys = int(pltpu.get_tpu_info().vmem_capacity_bytes)
    except Exception:
        pass
    return min(96 * 1024 * 1024, (phys * 3) // 4)


# --------------------------- fused decoder kernel ---------------------------

def fft_decoder_kernel(x0_ref, bias_ref, npm_ref,
                       wq_ref, wk_ref, wv_ref, bq_ref, bk_ref, bv_ref,
                       wfc_ref, bfc_ref, ln1g_ref, ln1b_ref,
                       w1_ref, b1_ref, w2_ref, b2_ref, ln2g_ref, ln2b_ref,
                       o_ref, *scratch,
                       n_head, d_k, d_v, TB, L, D, d_hid, k1, p1, k2, p2):
    l = pl.program_id(1)
    M = TB * L

    # Optional persistent padded scratches for the im2col convolutions.
    si = 0
    xp_sc = None
    hp_sc = None
    if k1 > 1 or p1 > 0:
        xp_sc = scratch[si]
        si += 1
    if k2 > 1 or p2 > 0:
        hp_sc = scratch[si]
        si += 1

    # Layer 0: seed the VMEM-resident output block (the layer-carried
    # activation) with the pos-embedded input, and zero the conv pad rows once.
    @pl.when(l == 0)
    def _():
        o_ref[...] = x0_ref[...]
        if xp_sc is not None:
            xp_sc[...] = jnp.zeros_like(xp_sc)
        if hp_sc is not None:
            hp_sc[...] = jnp.zeros_like(hp_sc)

    x = o_ref[...]                          # (TB, L, D)  f32 carried activation
    xf = x.reshape(M, D)                    # flattened for the big matmuls
    xb = xf.astype(jnp.bfloat16)            # cast ONCE for all Q/K/V matmuls
    bias = bias_ref[...]                    # (TB, 1, L)  0 / -1e30 key-pad bias
    npmf = npm_ref[...].reshape(M, 1)       # (M, 1)      non-pad mask

    inv_temp = 1.0 / (d_k ** 0.5)

    # ----------------------- multi-head self attention -----------------------
    # Head weights are indexed on LEADING axes of the refs (free, no lane
    # slicing of activations).  Scores/contexts are TB-batched einsums.
    ohs = []
    for h in range(n_head):
        qh = (jnp.dot(xb, wq_ref[0, h], preferred_element_type=jnp.float32)
              + bq_ref[0, h]).astype(jnp.bfloat16).reshape(TB, L, d_k)
        kh = (jnp.dot(xb, wk_ref[0, h], preferred_element_type=jnp.float32)
              + bk_ref[0, h]).astype(jnp.bfloat16).reshape(TB, L, d_k)
        vh = (jnp.dot(xb, wv_ref[0, h], preferred_element_type=jnp.float32)
              + bv_ref[0, h]).astype(jnp.bfloat16).reshape(TB, L, d_v)

        s = jnp.einsum('bqd,bkd->bqk', qh, kh,
                       preferred_element_type=jnp.float32)            # (TB, L, L)
        s = s * inv_temp + bias              # masked_fill(-inf) -> finite -1e30
        m = jnp.max(s, axis=-1, keepdims=True)
        e = jnp.exp(s - m)
        denom = jnp.sum(e, axis=-1, keepdims=True)
        p = e * pl.reciprocal(denom, approx=True)                     # softmax

        oh = jnp.einsum('bqk,bkd->bqd', p.astype(jnp.bfloat16), vh,
                        preferred_element_type=jnp.float32)           # (TB, L, d_v)
        ohs.append(oh)

    # Concat heads once, then a SINGLE output-projection matmul (K = H*d_v).
    o_cat = jnp.concatenate(ohs, axis=-1).reshape(M, n_head * d_v)
    y = jnp.dot(o_cat.astype(jnp.bfloat16), wfc_ref[0],
                preferred_element_type=jnp.float32) + bfc_ref[0]
    # dropout == identity (eval mode)
    z = _layer_norm(y + xf, ln1g_ref[0], ln1b_ref[0]) * npmf          # (M, D)

    # ------------------- position-wise FFN (Conv1d via im2col) ---------------
    zb = z.astype(jnp.bfloat16)
    if xp_sc is not None:
        # pad rows stay zero (initialized at l == 0); overwrite the middle.
        xp_sc[:, p1:p1 + L, :] = zb.reshape(TB, L, D)
        cols = jnp.concatenate([xp_sc[:, k:k + L, :] for k in range(k1)],
                               axis=-1).reshape(M, k1 * D)            # (M, k1*D)
    else:
        cols = zb
    h_act = jnp.dot(cols, w1_ref[0], preferred_element_type=jnp.float32) + b1_ref[0]
    h_act = jnp.maximum(h_act, 0.0)                                   # ReLU

    hb = h_act.astype(jnp.bfloat16)
    if hp_sc is not None:
        hp_sc[:, p2:p2 + L, :] = hb.reshape(TB, L, d_hid)
        cols2 = jnp.concatenate([hp_sc[:, k:k + L, :] for k in range(k2)],
                                axis=-1).reshape(M, k2 * d_hid)
    else:
        cols2 = hb
    y2 = jnp.dot(cols2, w2_ref[0], preferred_element_type=jnp.float32) + b2_ref[0]
    # dropout == identity (eval mode)
    z2 = _layer_norm(y2 + z, ln2g_ref[0], ln2b_ref[0]) * npmf

    # Single store per layer: the output block carries the activation to the
    # next layer iteration and is flushed to HBM only when the batch block
    # index changes.
    o_ref[...] = z2.reshape(TB, L, D)


# ------------------------------ decoder glue --------------------------------

def decoder_forward(enc_seq, mel_pos, params, cfg):
    pad_id = cfg['pad_id']
    B, L, D = enc_seq.shape
    H = cfg['num_heads']
    d_k = D // H
    d_v = D // H
    d_hid = cfg['fft_conv1d_filter_size']
    k1, k2 = cfg['fft_conv1d_kernel']
    p1, p2 = cfg['fft_conv1d_padding']
    NL = cfg['num_layers']
    # conv stack must preserve the sequence length for the residual add
    assert L + 2 * p1 - k1 + 1 == L and L + 2 * p2 - k2 + 1 == L

    # Batch block: amortize per-layer weight HBM traffic across TB sequences
    # and raise the matmul M-dim to TB*L.
    TB = 1
    for t in range(1, B + 1):
        if B % t == 0 and t * L <= 1024:
            TB = t

    # position embedding lookup (gather stays in plain JAX glue)
    x0 = enc_seq + jnp.take(params['pos_emb'], mel_pos, axis=0)       # (B, L, D)
    # additive key-pad bias (replaces the (B, L, L) mask) and non-pad mask
    attn_bias = jnp.where(mel_pos == pad_id, -1e30, 0.0).astype(jnp.float32)[:, None, :]
    npm = (mel_pos != pad_id).astype(jnp.float32)[:, :, None]

    kern = functools.partial(
        fft_decoder_kernel, n_head=H, d_k=d_k, d_v=d_v, TB=TB, L=L, D=D,
        d_hid=d_hid, k1=k1, p1=p1, k2=k2, p2=p2)

    scratch_shapes = []
    if k1 > 1 or p1 > 0:
        scratch_shapes.append(pltpu.VMEM((TB, L + 2 * p1, D), jnp.bfloat16))
    if k2 > 1 or p2 > 0:
        scratch_shapes.append(pltpu.VMEM((TB, L + 2 * p2, d_hid), jnp.bfloat16))

    w_names = ['wq', 'wk', 'wv', 'bq', 'bk', 'bv', 'wfc', 'bfc',
               'ln1_g', 'ln1_b', 'w1', 'b1', 'w2', 'b2', 'ln2_g', 'ln2_b']

    def wspec(name):
        a = params[name]
        nd = a.ndim
        return pl.BlockSpec((1,) + a.shape[1:],
                            lambda b, l, _n=nd: (l,) + (0,) * (_n - 1))

    return pl.pallas_call(
        kern,
        out_shape=jax.ShapeDtypeStruct((B, L, D), jnp.float32),
        grid=(B // TB, NL),
        in_specs=[pl.BlockSpec((TB, L, D), lambda b, l: (b, 0, 0)),   # x0
                  pl.BlockSpec((TB, 1, L), lambda b, l: (b, 0, 0)),   # attn bias
                  pl.BlockSpec((TB, L, 1), lambda b, l: (b, 0, 0))]   # non-pad mask
                 + [wspec(n) for n in w_names],
        out_specs=pl.BlockSpec((TB, L, D), lambda b, l: (b, 0, 0)),
        scratch_shapes=scratch_shapes,
        compiler_params=pltpu.CompilerParams(
            dimension_semantics=("parallel", "arbitrary"),
            vmem_limit_bytes=_vmem_limit_bytes()),
    )(x0, attn_bias, npm, *[params[n] for n in w_names])


# -------------------------------- params -----------------------------------

def init_params(key, cfg):
    D = cfg['hidden_size']
    H = cfg['num_heads']
    d_k = D // H
    d_v = D // H
    d_hid = cfg['fft_conv1d_filter_size']
    k1, k2 = cfg['fft_conv1d_kernel']
    NL = cfg['num_layers']

    keys = jax.random.split(key, 1 + 12 * NL)
    pos_emb = 0.02 * jax.random.normal(keys[0], (cfg['max_seq_len'] + 1, D), jnp.float32)
    pos_emb = pos_emb.at[cfg['pad_id']].set(0.0)                      # padding_idx row

    per_layer = []
    it = [1]

    def nk():
        kk = keys[it[0]]
        it[0] += 1
        return kk

    for _ in range(NL):
        std_qk = (2.0 / (D + d_k)) ** 0.5
        std_v = (2.0 / (D + d_v)) ** 0.5
        std_fc = (2.0 / (D + H * d_v)) ** 0.5
        lp = dict(
            # per-head projection weights, pre-transposed (in, out): x @ w
            wq=std_qk * jax.random.normal(nk(), (H, D, d_k), jnp.float32),
            wk=std_qk * jax.random.normal(nk(), (H, D, d_k), jnp.float32),
            wv=std_v * jax.random.normal(nk(), (H, D, d_v), jnp.float32),
            bq=0.01 * jax.random.normal(nk(), (H, 1, d_k), jnp.float32),
            bk=0.01 * jax.random.normal(nk(), (H, 1, d_k), jnp.float32),
            bv=0.01 * jax.random.normal(nk(), (H, 1, d_v), jnp.float32),
            # fc.weight.T, heads stacked along the contraction axis
            wfc=std_fc * jax.random.normal(nk(), (H * d_v, D), jnp.float32),
            bfc=0.01 * jax.random.normal(nk(), (1, D), jnp.float32),
            ln1_g=jnp.ones((1, D), jnp.float32),
            ln1_b=jnp.zeros((1, D), jnp.float32),
            # Conv1d weights in im2col layout: w1[k*D + c, o] == torch_w1[o, c, k]
            w1=0.1 * jax.random.normal(nk(), (k1 * D, d_hid), jnp.float32),
            b1=0.01 * jax.random.normal(nk(), (1, d_hid), jnp.float32),
            w2=0.1 * jax.random.normal(nk(), (k2 * d_hid, D), jnp.float32),
            b2=0.01 * jax.random.normal(nk(), (1, D), jnp.float32),
            ln2_g=jnp.ones((1, D), jnp.float32),
            ln2_b=jnp.zeros((1, D), jnp.float32),
        )
        per_layer.append(lp)

    stacked = {k: jnp.stack([lp[k] for lp in per_layer], axis=0) for k in per_layer[0]}
    # matmul weights in bf16 (MXU inputs); biases / LayerNorm params stay f32
    for name in ('wq', 'wk', 'wv', 'wfc', 'w1', 'w2'):
        stacked[name] = stacked[name].astype(jnp.bfloat16)
    return dict(pos_emb=pos_emb, **stacked)


# ---------------------------------- main -----------------------------------

if __name__ == "__main__":
    cfg = dict(
        pad_id=0,
        max_seq_len=32,
        hidden_size=32,
        num_heads=2,
        fft_conv1d_filter_size=64,
        fft_conv1d_kernel=(3, 1),
        fft_conv1d_padding=(1, 0),
        num_layers=2,
        dropout=0.1,   # TODO(synk): dropout is identity here (eval-mode / deterministic)
    )
    B, L = 2, 16
    D = cfg['hidden_size']

    key = jax.random.PRNGKey(0)
    k_in, k_par = jax.random.split(key)
    enc_seq = jax.random.normal(k_in, (B, L, D), jnp.float32)

    # mel_pos: 1..L for batch 0; batch 1 has 4 trailing pad positions (pad_id=0)
    pos0 = jnp.arange(1, L + 1, dtype=jnp.int32)
    pos1 = jnp.where(jnp.arange(L) < 12, jnp.arange(1, L + 1), 0).astype(jnp.int32)
    mel_pos = jnp.stack([pos0, pos1], axis=0)                         # (B, L) int32

    params = init_params(k_par, cfg)

    out = decoder_forward(enc_seq, mel_pos, params, cfg)
    out = jax.block_until_ready(out)
    assert out.shape == (B, L, D)
    assert bool(jnp.all(jnp.isfinite(out)))
    print("KERNEL_OK")
</pallas_src>

<mosaic_0001>
module attributes {stable_mosaic.version = 11 : i64} {
  func.func @fft_decoder_kernel(%arg0: i32, %arg1: i32, %arg2: memref<2x16x32xf32, #tpu.memory_space<vmem>>, %arg3: memref<2x1x16xf32, #tpu.memory_space<vmem>>, %arg4: memref<2x16x1xf32, #tpu.memory_space<vmem>>, %arg5: memref<1x2x32x16xbf16, #tpu.memory_space<vmem>>, %arg6: memref<1x2x32x16xbf16, #tpu.memory_space<vmem>>, %arg7: memref<1x2x32x16xbf16, #tpu.memory_space<vmem>>, %arg8: memref<1x2x1x16xf32, #tpu.memory_space<vmem>>, %arg9: memref<1x2x1x16xf32, #tpu.memory_space<vmem>>, %arg10: memref<1x2x1x16xf32, #tpu.memory_space<vmem>>, %arg11: memref<1x32x32xbf16, #tpu.memory_space<vmem>>, %arg12: memref<1x1x32xf32, #tpu.memory_space<vmem>>, %arg13: memref<1x1x32xf32, #tpu.memory_space<vmem>>, %arg14: memref<1x1x32xf32, #tpu.memory_space<vmem>>, %arg15: memref<1x96x64xbf16, #tpu.memory_space<vmem>>, %arg16: memref<1x1x64xf32, #tpu.memory_space<vmem>>, %arg17: memref<1x64x32xbf16, #tpu.memory_space<vmem>>, %arg18: memref<1x1x32xf32, #tpu.memory_space<vmem>>, %arg19: memref<1x1x32xf32, #tpu.memory_space<vmem>>, %arg20: memref<1x1x32xf32, #tpu.memory_space<vmem>>, %arg21: memref<2x16x32xf32, #tpu.memory_space<vmem>>, %arg22: memref<2x18x32xbf16, #tpu.memory_space<vmem>>) attributes {dimension_semantics = [#tpu.dimension_semantics<parallel>, #tpu.dimension_semantics<arbitrary>], iteration_bounds = array<i64: 1, 2>, scalar_prefetch = 0 : i64, scratch_operands = 1 : i64, tpu.core_type = #tpu.core_type<tc>, window_params = [{transform_indices = @transform_0, window_bounds = array<i64: 2, 16, 32>}, {transform_indices = @transform_1, window_bounds = array<i64: 2, 1, 16>}, {transform_indices = @transform_2, window_bounds = array<i64: 2, 16, 1>}, {transform_indices = @transform_3, window_bounds = array<i64: 1, 2, 32, 16>}, {transform_indices = @transform_4, window_bounds = array<i64: 1, 2, 32, 16>}, {transform_indices = @transform_5, window_bounds = array<i64: 1, 2, 32, 16>}, {transform_indices = @transform_6, window_bounds = array<i64: 1, 2, 1, 16>}, {transform_indices = @transform_7, window_bounds = array<i64: 1, 2, 1, 16>}, {transform_indices = @transform_8, window_bounds = array<i64: 1, 2, 1, 16>}, {transform_indices = @transform_9, window_bounds = array<i64: 1, 32, 32>}, {transform_indices = @transform_10, window_bounds = array<i64: 1, 1, 32>}, {transform_indices = @transform_11, window_bounds = array<i64: 1, 1, 32>}, {transform_indices = @transform_12, window_bounds = array<i64: 1, 1, 32>}, {transform_indices = @transform_13, window_bounds = array<i64: 1, 96, 64>}, {transform_indices = @transform_14, window_bounds = array<i64: 1, 1, 64>}, {transform_indices = @transform_15, window_bounds = array<i64: 1, 64, 32>}, {transform_indices = @transform_16, window_bounds = array<i64: 1, 1, 32>}, {transform_indices = @transform_17, window_bounds = array<i64: 1, 1, 32>}, {transform_indices = @transform_18, window_bounds = array<i64: 1, 1, 32>}, {transform_indices = @transform_19, window_bounds = array<i64: 2, 16, 32>}]} {
    %c0_i32 = arith.constant 0 : i32
    %0 = arith.cmpi eq, %arg1, %c0_i32 : i32
    %1 = arith.extui %0 : i1 to i32
    %c0_i32_0 = arith.constant 0 : i32
    %2 = arith.cmpi ne, %1, %c0_i32_0 : i32
    scf.if %2 {
      %c0_129 = arith.constant 0 : index
      %c0_130 = arith.constant 0 : index
      %c0_131 = arith.constant 0 : index
      %192 = vector.load %arg2[%c0_129, %c0_130, %c0_131] : memref<2x16x32xf32, #tpu.memory_space<vmem>>, vector<2x16x32xf32>
      %c0_132 = arith.constant 0 : index
      %c0_133 = arith.constant 0 : index
      %c0_134 = arith.constant 0 : index
      %193 = vector.load %arg21[%c0_132, %c0_133, %c0_134] : memref<2x16x32xf32, #tpu.memory_space<vmem>>, vector<2x16x32xf32>
      tpu.vector_store %arg21[%c0_132, %c0_133, %c0_134], %192 {strides = array<i32>} : memref<2x16x32xf32, #tpu.memory_space<vmem>>, vector<2x16x32xf32>,
      %cst_135 = arith.constant 0.000000e+00 : bf16
      %194 = vector.broadcast %cst_135 : bf16 to vector<2x18x32xbf16>
      %c0_136 = arith.constant 0 : index
      %c0_137 = arith.constant 0 : index
      %c0_138 = arith.constant 0 : index
      %195 = vector.load %arg22[%c0_136, %c0_137, %c0_138] : memref<2x18x32xbf16, #tpu.memory_space<vmem>>, vector<2x18x32xbf16>
      tpu.vector_store %arg22[%c0_136, %c0_137, %c0_138], %194 {strides = array<i32>} : memref<2x18x32xbf16, #tpu.memory_space<vmem>>, vector<2x18x32xbf16>,
    } else {
    }
    %c0 = arith.constant 0 : index
    %c0_1 = arith.constant 0 : index
    %c0_2 = arith.constant 0 : index
    %3 = vector.load %arg21[%c0, %c0_1, %c0_2] : memref<2x16x32xf32, #tpu.memory_space<vmem>>, vector<2x16x32xf32>
    %4 = vector.shape_cast %3 : vector<2x16x32xf32> to vector<32x32xf32>
    %5 = arith.truncf %4 : vector<32x32xf32> to vector<32x32xbf16>
    %c0_3 = arith.constant 0 : index
    %c0_4 = arith.constant 0 : index
    %c0_5 = arith.constant 0 : index
    %6 = vector.load %arg3[%c0_3, %c0_4, %c0_5] : memref<2x1x16xf32, #tpu.memory_space<vmem>>, vector<2x1x16xf32>
    %c0_6 = arith.constant 0 : index
    %c0_7 = arith.constant 0 : index
    %c0_8 = arith.constant 0 : index
    %7 = vector.load %arg4[%c0_6, %c0_7, %c0_8] : memref<2x16x1xf32, #tpu.memory_space<vmem>>, vector<2x16x1xf32>
    %8 = vector.shape_cast %7 : vector<2x16x1xf32> to vector<32x1xf32>
    %c0_9 = arith.constant 0 : index
    %c0_10 = arith.constant 0 : index
    %c0_11 = arith.constant 0 : index
    %c0_12 = arith.constant 0 : index
    %9 = vector.load %arg5[%c0_9, %c0_10, %c0_11, %c0_12] : memref<1x2x32x16xbf16, #tpu.memory_space<vmem>>, vector<1x1x32x16xbf16>
    %10 = vector.shape_cast %9 : vector<1x1x32x16xbf16> to vector<32x16xbf16>
    %cst = arith.constant dense<0.000000e+00> : vector<32x16xf32>
    %11 = tpu.matmul %5, %10, %cst {dimension_numbers = #tpu.dot_dimension_numbers<[1], [0], [0], [1], [0, 0, 1, 1], [], []>} : vector<32x32xbf16>, vector<32x16xbf16>, vector<32x16xf32> -> vector<32x16xf32>
    %c0_13 = arith.constant 0 : index
    %c0_14 = arith.constant 0 : index
    %c0_15 = arith.constant 0 : index
    %c0_16 = arith.constant 0 : index
    %12 = vector.load %arg8[%c0_13, %c0_14, %c0_15, %c0_16] : memref<1x2x1x16xf32, #tpu.memory_space<vmem>>, vector<1x1x1x16xf32>
    %13 = vector.shape_cast %12 : vector<1x1x1x16xf32> to vector<1x16xf32>
    %14 = vector.broadcast %13 : vector<1x16xf32> to vector<32x16xf32>
    %15 = arith.addf %11, %14 : vector<32x16xf32>
    %16 = arith.truncf %15 : vector<32x16xf32> to vector<32x16xbf16>
    %17 = vector.shape_cast %16 : vector<32x16xbf16> to vector<2x16x16xbf16>
    %c0_17 = arith.constant 0 : index
    %c0_18 = arith.constant 0 : index
    %c0_19 = arith.constant 0 : index
    %c0_20 = arith.constant 0 : index
    %18 = vector.load %arg6[%c0_17, %c0_18, %c0_19, %c0_20] : memref<1x2x32x16xbf16, #tpu.memory_space<vmem>>, vector<1x1x32x16xbf16>
    %19 = vector.shape_cast %18 : vector<1x1x32x16xbf16> to vector<32x16xbf16>
    %cst_21 = arith.constant dense<0.000000e+00> : vector<32x16xf32>
    %20 = tpu.matmul %5, %19, %cst_21 {dimension_numbers = #tpu.dot_dimension_numbers<[1], [0], [0], [1], [0, 0, 1, 1], [], []>} : vector<32x32xbf16>, vector<32x16xbf16>, vector<32x16xf32> -> vector<32x16xf32>
    %c0_22 = arith.constant 0 : index
    %c0_23 = arith.constant 0 : index
    %c0_24 = arith.constant 0 : index
    %c0_25 = arith.constant 0 : index
    %21 = vector.load %arg9[%c0_22, %c0_23, %c0_24, %c0_25] : memref<1x2x1x16xf32, #tpu.memory_space<vmem>>, vector<1x1x1x16xf32>
    %22 = vector.shape_cast %21 : vector<1x1x1x16xf32> to vector<1x16xf32>
    %23 = vector.broadcast %22 : vector<1x16xf32> to vector<32x16xf32>
    %24 = arith.addf %20, %23 : vector<32x16xf32>
    %25 = arith.truncf %24 : vector<32x16xf32> to vector<32x16xbf16>
    %26 = vector.shape_cast %25 : vector<32x16xbf16> to vector<2x16x16xbf16>
    %c0_26 = arith.constant 0 : index
    %c0_27 = arith.constant 0 : index
    %c0_28 = arith.constant 0 : index
    %c0_29 = arith.constant 0 : index
    %27 = vector.load %arg7[%c0_26, %c0_27, %c0_28, %c0_29] : memref<1x2x32x16xbf16, #tpu.memory_space<vmem>>, vector<1x1x32x16xbf16>
    %28 = vector.shape_cast %27 : vector<1x1x32x16xbf16> to vector<32x16xbf16>
    %cst_30 = arith.constant dense<0.000000e+00> : vector<32x16xf32>
    %29 = tpu.matmul %5, %28, %cst_30 {dimension_numbers = #tpu.dot_dimension_numbers<[1], [0], [0], [1], [0, 0, 1, 1], [], []>} : vector<32x32xbf16>, vector<32x16xbf16>, vector<32x16xf32> -> vector<32x16xf32>
    %c0_31 = arith.constant 0 : index
    %c0_32 = arith.constant 0 : index
    %c0_33 = arith.constant 0 : index
    %c0_34 = arith.constant 0 : index
    %30 = vector.load %arg10[%c0_31, %c0_32, %c0_33, %c0_34] : memref<1x2x1x16xf32, #tpu.memory_space<vmem>>, vector<1x1x1x16xf32>
    %31 = vector.shape_cast %30 : vector<1x1x1x16xf32> to vector<1x16xf32>
    %32 = vector.broadcast %31 : vector<1x16xf32> to vector<32x16xf32>
    %33 = arith.addf %29, %32 : vector<32x16xf32>
    %34 = arith.truncf %33 : vector<32x16xf32> to vector<32x16xbf16>
    %35 = vector.shape_cast %34 : vector<32x16xbf16> to vector<2x16x16xbf16>
    "tpu.trace_start"() <{level = 10 : i32, message = "bqd,bkd->bqk"}> : () -> ()
    %cst_35 = arith.constant dense<0.000000e+00> : vector<2x16x16xf32>
    %36 = tpu.matmul %17, %26, %cst_35 {dimension_numbers = #tpu.dot_dimension_numbers<[2], [2], [1], [1], [0, 0, 0, 1, 1, 1], [0], [0]>} : vector<2x16x16xbf16>, vector<2x16x16xbf16>, vector<2x16x16xf32> -> vector<2x16x16xf32>
    "tpu.trace_stop"() : () -> ()
    %cst_36 = arith.constant 2.500000e-01 : f32
    %37 = vector.broadcast %cst_36 : f32 to vector<2x16x16xf32>
    %38 = arith.mulf %36, %37 : vector<2x16x16xf32>
    %39 = vector.broadcast %6 : vector<2x1x16xf32> to vector<2x16x16xf32>
    %40 = arith.addf %38, %39 : vector<2x16x16xf32>
    %cst_37 = arith.constant dense<0xFF800000> : vector<2x16xf32>
    %41 = vector.multi_reduction <maximumf>, %40, %cst_37 [2] : vector<2x16x16xf32> to vector<2x16xf32>
    %42 = vector.shape_cast %41 : vector<2x16xf32> to vector<2x16x1xf32>
    %43 = vector.broadcast %42 : vector<2x16x1xf32> to vector<2x16x16xf32>
    %44 = arith.subf %40, %43 : vector<2x16x16xf32>
    %45 = math.exp %44 : vector<2x16x16xf32>
    %cst_38 = arith.constant dense<0.000000e+00> : vector<2x16xf32>
    %46 = vector.multi_reduction <add>, %45, %cst_38 [2] : vector<2x16x16xf32> to vector<2x16xf32>
    %47 = vector.shape_cast %46 : vector<2x16xf32> to vector<2x16x1xf32>
    %48 = tpu.reciprocal %47 {approx = true} : vector<2x16x1xf32> -> vector<2x16x1xf32>
    %49 = vector.broadcast %48 : vector<2x16x1xf32> to vector<2x16x16xf32>
    %50 = arith.mulf %45, %49 : vector<2x16x16xf32>
    %51 = arith.truncf %50 : vector<2x16x16xf32> to vector<2x16x16xbf16>
    "tpu.trace_start"() <{level = 10 : i32, message = "bqk,bkd->bqd"}> : () -> ()
    %cst_39 = arith.constant dense<0.000000e+00> : vector<2x16x16xf32>
    %52 = tpu.matmul %51, %35, %cst_39 {dimension_numbers = #tpu.dot_dimension_numbers<[2], [1], [1], [2], [0, 0, 0, 1, 1, 2], [0], [0]>} : vector<2x16x16xbf16>, vector<2x16x16xbf16>, vector<2x16x16xf32> -> vector<2x16x16xf32>
    "tpu.trace_stop"() : () -> ()
    %c0_40 = arith.constant 0 : index
    %c1 = arith.constant 1 : index
    %c0_41 = arith.constant 0 : index
    %c0_42 = arith.constant 0 : index
    %53 = vector.load %arg5[%c0_40, %c1, %c0_41, %c0_42] : memref<1x2x32x16xbf16, #tpu.memory_space<vmem>>, vector<1x1x32x16xbf16>
    %54 = vector.shape_cast %53 : vector<1x1x32x16xbf16> to vector<32x16xbf16>
    %cst_43 = arith.constant dense<0.000000e+00> : vector<32x16xf32>
    %55 = tpu.matmul %5, %54, %cst_43 {dimension_numbers = #tpu.dot_dimension_numbers<[1], [0], [0], [1], [0, 0, 1, 1], [], []>} : vector<32x32xbf16>, vector<32x16xbf16>, vector<32x16xf32> -> vector<32x16xf32>
    %c0_44 = arith.constant 0 : index
    %c1_45 = arith.constant 1 : index
    %c0_46 = arith.constant 0 : index
    %c0_47 = arith.constant 0 : index
    %56 = vector.load %arg8[%c0_44, %c1_45, %c0_46, %c0_47] : memref<1x2x1x16xf32, #tpu.memory_space<vmem>>, vector<1x1x1x16xf32>
    %57 = vector.shape_cast %56 : vector<1x1x1x16xf32> to vector<1x16xf32>
    %58 = vector.broadcast %57 : vector<1x16xf32> to vector<32x16xf32>
    %59 = arith.addf %55, %58 : vector<32x16xf32>
    %60 = arith.truncf %59 : vector<32x16xf32> to vector<32x16xbf16>
    %61 = vector.shape_cast %60 : vector<32x16xbf16> to vector<2x16x16xbf16>
    %c0_48 = arith.constant 0 : index
    %c1_49 = arith.constant 1 : index
    %c0_50 = arith.constant 0 : index
    %c0_51 = arith.constant 0 : index
    %62 = vector.load %arg6[%c0_48, %c1_49, %c0_50, %c0_51] : memref<1x2x32x16xbf16, #tpu.memory_space<vmem>>, vector<1x1x32x16xbf16>
    %63 = vector.shape_cast %62 : vector<1x1x32x16xbf16> to vector<32x16xbf16>
    %cst_52 = arith.constant dense<0.000000e+00> : vector<32x16xf32>
    %64 = tpu.matmul %5, %63, %cst_52 {dimension_numbers = #tpu.dot_dimension_numbers<[1], [0], [0], [1], [0, 0, 1, 1], [], []>} : vector<32x32xbf16>, vector<32x16xbf16>, vector<32x16xf32> -> vector<32x16xf32>
    %c0_53 = arith.constant 0 : index
    %c1_54 = arith.constant 1 : index
    %c0_55 = arith.constant 0 : index
    %c0_56 = arith.constant 0 : index
    %65 = vector.load %arg9[%c0_53, %c1_54, %c0_55, %c0_56] : memref<1x2x1x16xf32, #tpu.memory_space<vmem>>, vector<1x1x1x16xf32>
    %66 = vector.shape_cast %65 : vector<1x1x1x16xf32> to vector<1x16xf32>
    %67 = vector.broadcast %66 : vector<1x16xf32> to vector<32x16xf32>
    %68 = arith.addf %64, %67 : vector<32x16xf32>
    %69 = arith.truncf %68 : vector<32x16xf32> to vector<32x16xbf16>
    %70 = vector.shape_cast %69 : vector<32x16xbf16> to vector<2x16x16xbf16>
    %c0_57 = arith.constant 0 : index
    %c1_58 = arith.constant 1 : index
    %c0_59 = arith.constant 0 : index
    %c0_60 = arith.constant 0 : index
    %71 = vector.load %arg7[%c0_57, %c1_58, %c0_59, %c0_60] : memref<1x2x32x16xbf16, #tpu.memory_space<vmem>>, vector<1x1x32x16xbf16>
    %72 = vector.shape_cast %71 : vector<1x1x32x16xbf16> to vector<32x16xbf16>
    %cst_61 = arith.constant dense<0.000000e+00> : vector<32x16xf32>
    %73 = tpu.matmul %5, %72, %cst_61 {dimension_numbers = #tpu.dot_dimension_numbers<[1], [0], [0], [1], [0, 0, 1, 1], [], []>} : vector<32x32xbf16>, vector<32x16xbf16>, vector<32x16xf32> -> vector<32x16xf32>
    %c0_62 = arith.constant 0 : index
    %c1_63 = arith.constant 1 : index
    %c0_64 = arith.constant 0 : index
    %c0_65 = arith.constant 0 : index
    %74 = vector.load %arg10[%c0_62, %c1_63, %c0_64, %c0_65] : memref<1x2x1x16xf32, #tpu.memory_space<vmem>>, vector<1x1x1x16xf32>
    %75 = vector.shape_cast %74 : vector<1x1x1x16xf32> to vector<1x16xf32>
    %76 = vector.broadcast %75 : vector<1x16xf32> to vector<32x16xf32>
    %77 = arith.addf %73, %76 : vector<32x16xf32>
    %78 = arith.truncf %77 : vector<32x16xf32> to vector<32x16xbf16>
    %79 = vector.shape_cast %78 : vector<32x16xbf16> to vector<2x16x16xbf16>
    "tpu.trace_start"() <{level = 10 : i32, message = "bqd,bkd->bqk"}> : () -> ()
    %cst_66 = arith.constant dense<0.000000e+00> : vector<2x16x16xf32>
    %80 = tpu.matmul %61, %70, %cst_66 {dimension_numbers = #tpu.dot_dimension_numbers<[2], [2], [1], [1], [0, 0, 0, 1, 1, 1], [0], [0]>} : vector<2x16x16xbf16>, vector<2x16x16xbf16>, vector<2x16x16xf32> -> vector<2x16x16xf32>
    "tpu.trace_stop"() : () -> ()
    %cst_67 = arith.constant 2.500000e-01 : f32
    %81 = vector.broadcast %cst_67 : f32 to vector<2x16x16xf32>
    %82 = arith.mulf %80, %81 : vector<2x16x16xf32>
    %83 = vector.broadcast %6 : vector<2x1x16xf32> to vector<2x16x16xf32>
    %84 = arith.addf %82, %83 : vector<2x16x16xf32>
    %cst_68 = arith.constant dense<0xFF800000> : vector<2x16xf32>
    %85 = vector.multi_reduction <maximumf>, %84, %cst_68 [2] : vector<2x16x16xf32> to vector<2x16xf32>
    %86 = vector.shape_cast %85 : vector<2x16xf32> to vector<2x16x1xf32>
    %87 = vector.broadcast %86 : vector<2x16x1xf32> to vector<2x16x16xf32>
    %88 = arith.subf %84, %87 : vector<2x16x16xf32>
    %89 = math.exp %88 : vector<2x16x16xf32>
    %cst_69 = arith.constant dense<0.000000e+00> : vector<2x16xf32>
    %90 = vector.multi_reduction <add>, %89, %cst_69 [2] : vector<2x16x16xf32> to vector<2x16xf32>
    %91 = vector.shape_cast %90 : vector<2x16xf32> to vector<2x16x1xf32>
    %92 = tpu.reciprocal %91 {approx = true} : vector<2x16x1xf32> -> vector<2x16x1xf32>
    %93 = vector.broadcast %92 : vector<2x16x1xf32> to vector<2x16x16xf32>
    %94 = arith.mulf %89, %93 : vector<2x16x16xf32>
    %95 = arith.truncf %94 : vector<2x16x16xf32> to vector<2x16x16xbf16>
    "tpu.trace_start"() <{level = 10 : i32, message = "bqk,bkd->bqd"}> : () -> ()
    %cst_70 = arith.constant dense<0.000000e+00> : vector<2x16x16xf32>
    %96 = tpu.matmul %95, %79, %cst_70 {dimension_numbers = #tpu.dot_dimension_numbers<[2], [1], [1], [2], [0, 0, 0, 1, 1, 2], [0], [0]>} : vector<2x16x16xbf16>, vector<2x16x16xbf16>, vector<2x16x16xf32> -> vector<2x16x16xf32>
    "tpu.trace_stop"() : () -> ()
    %97 = tpu.concatenate %52, %96 in 2 : vector<2x16x16xf32>, vector<2x16x16xf32> -> vector<2x16x32xf32>
    %98 = vector.shape_cast %97 : vector<2x16x32xf32> to vector<32x32xf32>
    %99 = arith.truncf %98 : vector<32x32xf32> to vector<32x32xbf16>
    %c0_71 = arith.constant 0 : index
    %c0_72 = arith.constant 0 : index
    %c0_73 = arith.constant 0 : index
    %100 = vector.load %arg11[%c0_71, %c0_72, %c0_73] : memref<1x32x32xbf16, #tpu.memory_space<vmem>>, vector<1x32x32xbf16>
    %101 = vector.shape_cast %100 : vector<1x32x32xbf16> to vector<32x32xbf16>
    %cst_74 = arith.constant dense<0.000000e+00> : vector<32x32xf32>
    %102 = tpu.matmul %99, %101, %cst_74 {dimension_numbers = #tpu.dot_dimension_numbers<[1], [0], [0], [1], [0, 0, 1, 1], [], []>} : vector<32x32xbf16>, vector<32x32xbf16>, vector<32x32xf32> -> vector<32x32xf32>
    %c0_75 = arith.constant 0 : index
    %c0_76 = arith.constant 0 : index
    %c0_77 = arith.constant 0 : index
    %103 = vector.load %arg12[%c0_75, %c0_76, %c0_77] : memref<1x1x32xf32, #tpu.memory_space<vmem>>, vector<1x1x32xf32>
    %104 = vector.shape_cast %103 : vector<1x1x32xf32> to vector<1x32xf32>
    %105 = vector.broadcast %104 : vector<1x32xf32> to vector<32x32xf32>
    %106 = arith.addf %102, %105 : vector<32x32xf32>
    %107 = arith.addf %106, %4 : vector<32x32xf32>
    %c0_78 = arith.constant 0 : index
    %c0_79 = arith.constant 0 : index
    %c0_80 = arith.constant 0 : index
    %108 = vector.load %arg13[%c0_78, %c0_79, %c0_80] : memref<1x1x32xf32, #tpu.memory_space<vmem>>, vector<1x1x32xf32>
    %109 = vector.shape_cast %108 : vector<1x1x32xf32> to vector<1x32xf32>
    %c0_81 = arith.constant 0 : index
    %c0_82 = arith.constant 0 : index
    %c0_83 = arith.constant 0 : index
    %110 = vector.load %arg14[%c0_81, %c0_82, %c0_83] : memref<1x1x32xf32, #tpu.memory_space<vmem>>, vector<1x1x32xf32>
    %111 = vector.shape_cast %110 : vector<1x1x32xf32> to vector<1x32xf32>
    %cst_84 = arith.constant dense<0.000000e+00> : vector<32xf32>
    %112 = vector.multi_reduction <add>, %107, %cst_84 [1] : vector<32x32xf32> to vector<32xf32>
    %113 = vector.shape_cast %112 : vector<32xf32> to vector<32x1xf32>
    %cst_85 = arith.constant 3.200000e+01 : f32
    %114 = vector.broadcast %cst_85 : f32 to vector<32x1xf32>
    %115 = arith.divf %113, %114 : vector<32x1xf32>
    %116 = vector.broadcast %115 : vector<32x1xf32> to vector<32x32xf32>
    %117 = arith.subf %107, %116 : vector<32x32xf32>
    %118 = arith.mulf %117, %117 : vector<32x32xf32>
    %cst_86 = arith.constant dense<0.000000e+00> : vector<32xf32>
    %119 = vector.multi_reduction <add>, %118, %cst_86 [1] : vector<32x32xf32> to vector<32xf32>
    %120 = vector.shape_cast %119 : vector<32xf32> to vector<32x1xf32>
    %cst_87 = arith.constant 3.200000e+01 : f32
    %121 = vector.broadcast %cst_87 : f32 to vector<32x1xf32>
    %122 = arith.divf %120, %121 : vector<32x1xf32>
    %123 = vector.broadcast %115 : vector<32x1xf32> to vector<32x32xf32>
    %124 = arith.subf %107, %123 : vector<32x32xf32>
    %cst_88 = arith.constant 9.99999974E-6 : f32
    %125 = vector.broadcast %cst_88 : f32 to vector<32x1xf32>
    %126 = arith.addf %122, %125 : vector<32x1xf32>
    %127 = math.rsqrt %126 : vector<32x1xf32>
    %128 = vector.broadcast %127 : vector<32x1xf32> to vector<32x32xf32>
    %129 = arith.mulf %124, %128 : vector<32x32xf32>
    %130 = vector.broadcast %109 : vector<1x32xf32> to vector<32x32xf32>
    %131 = arith.mulf %129, %130 : vector<32x32xf32>
    %132 = vector.broadcast %111 : vector<1x32xf32> to vector<32x32xf32>
    %133 = arith.addf %131, %132 : vector<32x32xf32>
    %134 = vector.broadcast %8 : vector<32x1xf32> to vector<32x32xf32>
    %135 = arith.mulf %133, %134 : vector<32x32xf32>
    %136 = arith.truncf %135 : vector<32x32xf32> to vector<32x32xbf16>
    %137 = vector.shape_cast %136 : vector<32x32xbf16> to vector<2x16x32xbf16>
    %c0_89 = arith.constant 0 : index
    %c1_90 = arith.constant 1 : index
    %c0_91 = arith.constant 0 : index
    %138 = vector.load %arg22[%c0_89, %c1_90, %c0_91] : memref<2x18x32xbf16, #tpu.memory_space<vmem>>, vector<2x16x32xbf16>
    tpu.vector_store %arg22[%c0_89, %c1_90, %c0_91], %137 {strides = array<i32>} : memref<2x18x32xbf16, #tpu.memory_space<vmem>>, vector<2x16x32xbf16>,
    %c0_92 = arith.constant 0 : index
    %c0_93 = arith.constant 0 : index
    %c0_94 = arith.constant 0 : index
    %139 = vector.load %arg22[%c0_92, %c0_93, %c0_94] : memref<2x18x32xbf16, #tpu.memory_space<vmem>>, vector<2x16x32xbf16>
    %c0_95 = arith.constant 0 : index
    %c1_96 = arith.constant 1 : index
    %c0_97 = arith.constant 0 : index
    %140 = vector.load %arg22[%c0_95, %c1_96, %c0_97] : memref<2x18x32xbf16, #tpu.memory_space<vmem>>, vector<2x16x32xbf16>
    %c0_98 = arith.constant 0 : index
    %c2 = arith.constant 2 : index
    %c0_99 = arith.constant 0 : index
    %141 = vector.load %arg22[%c0_98, %c2, %c0_99] : memref<2x18x32xbf16, #tpu.memory_space<vmem>>, vector<2x16x32xbf16>
    %142 = tpu.concatenate %139, %140, %141 in 2 : vector<2x16x32xbf16>, vector<2x16x32xbf16>, vector<2x16x32xbf16> -> vector<2x16x96xbf16>
    %143 = vector.shape_cast %142 : vector<2x16x96xbf16> to vector<32x96xbf16>
    %c0_100 = arith.constant 0 : index
    %c0_101 = arith.constant 0 : index
    %c0_102 = arith.constant 0 : index
    %144 = vector.load %arg15[%c0_100, %c0_101, %c0_102] : memref<1x96x64xbf16, #tpu.memory_space<vmem>>, vector<1x96x64xbf16>
    %145 = vector.shape_cast %144 : vector<1x96x64xbf16> to vector<96x64xbf16>
    %cst_103 = arith.constant dense<0.000000e+00> : vector<32x64xf32>
    %146 = tpu.matmul %143, %145, %cst_103 {dimension_numbers = #tpu.dot_dimension_numbers<[1], [0], [0], [1], [0, 0, 1, 1], [], []>} : vector<32x96xbf16>, vector<96x64xbf16>, vector<32x64xf32> -> vector<32x64xf32>
    %c0_104 = arith.constant 0 : index
    %c0_105 = arith.constant 0 : index
    %c0_106 = arith.constant 0 : index
    %147 = vector.load %arg16[%c0_104, %c0_105, %c0_106] : memref<1x1x64xf32, #tpu.memory_space<vmem>>, vector<1x1x64xf32>
    %148 = vector.shape_cast %147 : vector<1x1x64xf32> to vector<1x64xf32>
    %149 = vector.broadcast %148 : vector<1x64xf32> to vector<32x64xf32>
    %150 = arith.addf %146, %149 : vector<32x64xf32>
    %cst_107 = arith.constant 0.000000e+00 : f32
    %151 = vector.broadcast %cst_107 : f32 to vector<32x64xf32>
    %152 = arith.maximumf %150, %151 : vector<32x64xf32>
    %153 = arith.truncf %152 : vector<32x64xf32> to vector<32x64xbf16>
    %c0_108 = arith.constant 0 : index
    %c0_109 = arith.constant 0 : index
    %c0_110 = arith.constant 0 : index
    %154 = vector.load %arg17[%c0_108, %c0_109, %c0_110] : memref<1x64x32xbf16, #tpu.memory_space<vmem>>, vector<1x64x32xbf16>
    %155 = vector.shape_cast %154 : vector<1x64x32xbf16> to vector<64x32xbf16>
    %cst_111 = arith.constant dense<0.000000e+00> : vector<32x32xf32>
    %156 = tpu.matmul %153, %155, %cst_111 {dimension_numbers = #tpu.dot_dimension_numbers<[1], [0], [0], [1], [0, 0, 1, 1], [], []>} : vector<32x64xbf16>, vector<64x32xbf16>, vector<32x32xf32> -> vector<32x32xf32>
    %c0_112 = arith.constant 0 : index
    %c0_113 = arith.constant 0 : index
    %c0_114 = arith.constant 0 : index
    %157 = vector.load %arg18[%c0_112, %c0_113, %c0_114] : memref<1x1x32xf32, #tpu.memory_space<vmem>>, vector<1x1x32xf32>
    %158 = vector.shape_cast %157 : vector<1x1x32xf32> to vector<1x32xf32>
    %159 = vector.broadcast %158 : vector<1x32xf32> to vector<32x32xf32>
    %160 = arith.addf %156, %159 : vector<32x32xf32>
    %161 = arith.addf %160, %135 : vector<32x32xf32>
    %c0_115 = arith.constant 0 : index
    %c0_116 = arith.constant 0 : index
    %c0_117 = arith.constant 0 : index
    %162 = vector.load %arg19[%c0_115, %c0_116, %c0_117] : memref<1x1x32xf32, #tpu.memory_space<vmem>>, vector<1x1x32xf32>
    %163 = vector.shape_cast %162 : vector<1x1x32xf32> to vector<1x32xf32>
    %c0_118 = arith.constant 0 : index
    %c0_119 = arith.constant 0 : index
    %c0_120 = arith.constant 0 : index
    %164 = vector.load %arg20[%c0_118, %c0_119, %c0_120] : memref<1x1x32xf32, #tpu.memory_space<vmem>>, vector<1x1x32xf32>
    %165 = vector.shape_cast %164 : vector<1x1x32xf32> to vector<1x32xf32>
    %cst_121 = arith.constant dense<0.000000e+00> : vector<32xf32>
    %166 = vector.multi_reduction <add>, %161, %cst_121 [1] : vector<32x32xf32> to vector<32xf32>
    %167 = vector.shape_cast %166 : vector<32xf32> to vector<32x1xf32>
    %cst_122 = arith.constant 3.200000e+01 : f32
    %168 = vector.broadcast %cst_122 : f32 to vector<32x1xf32>
    %169 = arith.divf %167, %168 : vector<32x1xf32>
    %170 = vector.broadcast %169 : vector<32x1xf32> to vector<32x32xf32>
    %171 = arith.subf %161, %170 : vector<32x32xf32>
    %172 = arith.mulf %171, %171 : vector<32x32xf32>
    %cst_123 = arith.constant dense<0.000000e+00> : vector<32xf32>
    %173 = vector.multi_reduction <add>, %172, %cst_123 [1] : vector<32x32xf32> to vector<32xf32>
    %174 = vector.shape_cast %173 : vector<32xf32> to vector<32x1xf32>
    %cst_124 = arith.constant 3.200000e+01 : f32
    %175 = vector.broadcast %cst_124 : f32 to vector<32x1xf32>
    %176 = arith.divf %174, %175 : vector<32x1xf32>
    %177 = vector.broadcast %169 : vector<32x1xf32> to vector<32x32xf32>
    %178 = arith.subf %161, %177 : vector<32x32xf32>
    %cst_125 = arith.constant 9.99999974E-6 : f32
    %179 = vector.broadcast %cst_125 : f32 to vector<32x1xf32>
    %180 = arith.addf %176, %179 : vector<32x1xf32>
    %181 = math.rsqrt %180 : vector<32x1xf32>
    %182 = vector.broadcast %181 : vector<32x1xf32> to vector<32x32xf32>
    %183 = arith.mulf %178, %182 : vector<32x32xf32>
    %184 = vector.broadcast %163 : vector<1x32xf32> to vector<32x32xf32>
    %185 = arith.mulf %183, %184 : vector<32x32xf32>
    %186 = vector.broadcast %165 : vector<1x32xf32> to vector<32x32xf32>
    %187 = arith.addf %185, %186 : vector<32x32xf32>
    %188 = vector.broadcast %8 : vector<32x1xf32> to vector<32x32xf32>
    %189 = arith.mulf %187, %188 : vector<32x32xf32>
    %190 = vector.shape_cast %189 : vector<32x32xf32> to vector<2x16x32xf32>
    %c0_126 = arith.constant 0 : index
    %c0_127 = arith.constant 0 : index
    %c0_128 = arith.constant 0 : index
    %191 = vector.load %arg21[%c0_126, %c0_127, %c0_128] : memref<2x16x32xf32, #tpu.memory_space<vmem>>, vector<2x16x32xf32>
    tpu.vector_store %arg21[%c0_126, %c0_127, %c0_128], %190 {strides = array<i32>} : memref<2x16x32xf32, #tpu.memory_space<vmem>>, vector<2x16x32xf32>,
    return
  }
  func.func @transform_0(%arg0: i32, %arg1: i32) -> (i32, i32, i32) {
    %c0_i32 = arith.constant 0 : i32
    %c0_i32_0 = arith.constant 0 : i32
    %c0_i32_1 = arith.constant 0 : i32
    return %arg0, %c0_i32, %c0_i32_0 : i32, i32, i32
  }
  func.func @transform_1(%arg0: i32, %arg1: i32) -> (i32, i32, i32) {
    %c0_i32 = arith.constant 0 : i32
    %c0_i32_0 = arith.constant 0 : i32
    %c0_i32_1 = arith.constant 0 : i32
    return %arg0, %c0_i32, %c0_i32_0 : i32, i32, i32
  }
  func.func @transform_2(%arg0: i32, %arg1: i32) -> (i32, i32, i32) {
    %c0_i32 = arith.constant 0 : i32
    %c0_i32_0 = arith.constant 0 : i32
    %c0_i32_1 = arith.constant 0 : i32
    return %arg0, %c0_i32, %c0_i32_0 : i32, i32, i32
  }
  func.func @transform_3(%arg0: i32, %arg1: i32) -> (i32, i32, i32, i32) {
    %c0_i32 = arith.constant 0 : i32
    %c0_i32_0 = arith.constant 0 : i32
    %c0_i32_1 = arith.constant 0 : i32
    %c0_i32_2 = arith.constant 0 : i32
    return %arg1, %c0_i32, %c0_i32_0, %c0_i32_1 : i32, i32, i32, i32
  }
  func.func @transform_4(%arg0: i32, %arg1: i32) -> (i32, i32, i32, i32) {
    %c0_i32 = arith.constant 0 : i32
    %c0_i32_0 = arith.constant 0 : i32
    %c0_i32_1 = arith.constant 0 : i32
    %c0_i32_2 = arith.constant 0 : i32
    return %arg1, %c0_i32, %c0_i32_0, %c0_i32_1 : i32, i32, i32, i32
  }
  func.func @transform_5(%arg0: i32, %arg1: i32) -> (i32, i32, i32, i32) {
    %c0_i32 = arith.constant 0 : i32
    %c0_i32_0 = arith.constant 0 : i32
    %c0_i32_1 = arith.constant 0 : i32
    %c0_i32_2 = arith.constant 0 : i32
    return %arg1, %c0_i32, %c0_i32_0, %c0_i32_1 : i32, i32, i32, i32
  }
  func.func @transform_6(%arg0: i32, %arg1: i32) -> (i32, i32, i32, i32) {
    %c0_i32 = arith.constant 0 : i32
    %c0_i32_0 = arith.constant 0 : i32
    %c0_i32_1 = arith.constant 0 : i32
    %c0_i32_2 = arith.constant 0 : i32
    return %arg1, %c0_i32, %c0_i32_0, %c0_i32_1 : i32, i32, i32, i32
  }
  func.func @transform_7(%arg0: i32, %arg1: i32) -> (i32, i32, i32, i32) {
    %c0_i32 = arith.constant 0 : i32
    %c0_i32_0 = arith.constant 0 : i32
    %c0_i32_1 = arith.constant 0 : i32
    %c0_i32_2 = arith.constant 0 : i32
    return %arg1, %c0_i32, %c0_i32_0, %c0_i32_1 : i32, i32, i32, i32
  }
  func.func @transform_8(%arg0: i32, %arg1: i32) -> (i32, i32, i32, i32) {
    %c0_i32 = arith.constant 0 : i32
    %c0_i32_0 = arith.constant 0 : i32
    %c0_i32_1 = arith.constant 0 : i32
    %c0_i32_2 = arith.constant 0 : i32
    return %arg1, %c0_i32, %c0_i32_0, %c0_i32_1 : i32, i32, i32, i32
  }
  func.func @transform_9(%arg0: i32, %arg1: i32) -> (i32, i32, i32) {
    %c0_i32 = arith.constant 0 : i32
    %c0_i32_0 = arith.constant 0 : i32
    %c0_i32_1 = arith.constant 0 : i32
    return %arg1, %c0_i32, %c0_i32_0 : i32, i32, i32
  }
  func.func @transform_10(%arg0: i32, %arg1: i32) -> (i32, i32, i32) {
    %c0_i32 = arith.constant 0 : i32
    %c0_i32_0 = arith.constant 0 : i32
    %c0_i32_1 = arith.constant 0 : i32
    return %arg1, %c0_i32, %c0_i32_0 : i32, i32, i32
  }
  func.func @transform_11(%arg0: i32, %arg1: i32) -> (i32, i32, i32) {
    %c0_i32 = arith.constant 0 : i32
    %c0_i32_0 = arith.constant 0 : i32
    %c0_i32_1 = arith.constant 0 : i32
    return %arg1, %c0_i32, %c0_i32_0 : i32, i32, i32
  }
  func.func @transform_12(%arg0: i32, %arg1: i32) -> (i32, i32, i32) {
    %c0_i32 = arith.constant 0 : i32
    %c0_i32_0 = arith.constant 0 : i32
    %c0_i32_1 = arith.constant 0 : i32
    return %arg1, %c0_i32, %c0_i32_0 : i32, i32, i32
  }
  func.func @transform_13(%arg0: i32, %arg1: i32) -> (i32, i32, i32) {
    %c0_i32 = arith.constant 0 : i32
    %c0_i32_0 = arith.constant 0 : i32
    %c0_i32_1 = arith.constant 0 : i32
    return %arg1, %c0_i32, %c0_i32_0 : i32, i32, i32
  }
  func.func @transform_14(%arg0: i32, %arg1: i32) -> (i32, i32, i32) {
    %c0_i32 = arith.constant 0 : i32
    %c0_i32_0 = arith.constant 0 : i32
    %c0_i32_1 = arith.constant 0 : i32
    return %arg1, %c0_i32, %c0_i32_0 : i32, i32, i32
  }
  func.func @transform_15(%arg0: i32, %arg1: i32) -> (i32, i32, i32) {
    %c0_i32 = arith.constant 0 : i32
    %c0_i32_0 = arith.constant 0 : i32
    %c0_i32_1 = arith.constant 0 : i32
    return %arg1, %c0_i32, %c0_i32_0 : i32, i32, i32
  }
  func.func @transform_16(%arg0: i32, %arg1: i32) -> (i32, i32, i32) {
    %c0_i32 = arith.constant 0 : i32
    %c0_i32_0 = arith.constant 0 : i32
    %c0_i32_1 = arith.constant 0 : i32
    return %arg1, %c0_i32, %c0_i32_0 : i32, i32, i32
  }
  func.func @transform_17(%arg0: i32, %arg1: i32) -> (i32, i32, i32) {
    %c0_i32 = arith.constant 0 : i32
    %c0_i32_0 = arith.constant 0 : i32
    %c0_i32_1 = arith.constant 0 : i32
    return %arg1, %c0_i32, %c0_i32_0 : i32, i32, i32
  }
  func.func @transform_18(%arg0: i32, %arg1: i32) -> (i32, i32, i32) {
    %c0_i32 = arith.constant 0 : i32
    %c0_i32_0 = arith.constant 0 : i32
    %c0_i32_1 = arith.constant 0 : i32
    return %arg1, %c0_i32, %c0_i32_0 : i32, i32, i32
  }
  func.func @transform_19(%arg0: i32, %arg1: i32) -> (i32, i32, i32) {
    %c0_i32 = arith.constant 0 : i32
    %c0_i32_0 = arith.constant 0 : i32
    %c0_i32_1 = arith.constant 0 : i32
    return %arg0, %c0_i32, %c0_i32_0 : i32, i32, i32
  }
}

</mosaic_0001>

<bundles_post_ra>
// kernel: tpu_custom_call.1
= control target key start
LH: loop header
LB: loop body
LE: loop exit
PB: predicated region body
PF: predicated region fallthrough
CT: control target
= control target key end

     0   :  { %s3868_s0 = inlined_call_operand.vmem [shape: f32[2,16,32], index: 0, kind: input, shape index: {}]   ;;  %s3869_s1 = inlined_call_operand.vmem [shape: f32[2,1,16], index: 1, kind: input, shape index: {}]   ;;  %s3870_s2 = inlined_call_operand.vmem [shape: f32[2,16,1], index: 2, kind: input, shape index: {}]   ;;  %s3871_s3 = inlined_call_operand.vmem [shape: bf16[2,2,32,16], index: 3, kind: input, shape index: {}]   ;;  %s3872_s4 = inlined_call_operand.vmem [shape: bf16[2,2,32,16], index: 4, kind: input, shape index: {}]   ;;  %s3873_s5 = inlined_call_operand.vmem [shape: bf16[2,2,32,16], index: 5, kind: input, shape index: {}]   ;;  %s3874_s6 = inlined_call_operand.vmem [shape: f32[2,2,1,16], index: 6, kind: input, shape index: {}]   ;;  %s3875_s7 = inlined_call_operand.vmem [shape: f32[2,2,1,16], index: 7, kind: input, shape index: {}]   ;;  %s3876_s8 = inlined_call_operand.vmem [shape: f32[2,2,1,16], index: 8, kind: input, shape index: {}]   ;;  %s3877_s9 = inlined_call_operand.vmem [shape: bf16[2,32,32], index: 9, kind: input, shape index: {}]   ;;  %s3878_s10 = inlined_call_operand.vmem [shape: f32[2,1,32], index: 10, kind: input, shape index: {}]   ;;  %s3879_s11 = inlined_call_operand.vmem [shape: f32[2,1,32], index: 11, kind: input, shape index: {}]   ;;  %s3880_s12 = inlined_call_operand.vmem [shape: f32[2,1,32], index: 12, kind: input, shape index: {}]   ;;  %s3881_s13 = inlined_call_operand.vmem [shape: bf16[2,96,64], index: 13, kind: input, shape index: {}]   ;;  %s3882_s14 = inlined_call_operand.vmem [shape: f32[2,1,64], index: 14, kind: input, shape index: {}]   ;;  %s3883_s15 = inlined_call_operand.vmem [shape: bf16[2,64,32], index: 15, kind: input, shape index: {}]   ;;  %s3884_s16 = inlined_call_operand.vmem [shape: f32[2,1,32], index: 16, kind: input, shape index: {}]   ;;  %s3885_s17 = inlined_call_operand.vmem [shape: f32[2,1,32], index: 17, kind: input, shape index: {}]   ;;  %s3886_s18 = inlined_call_operand.vmem [shape: f32[2,1,32], index: 18, kind: input, shape index: {}]   ;;  %s3887_s19 = inlined_call_operand.hbm [shape: f32[2,16,32], index: 19, kind: output, shape index: {}]  }
   0x1   :  { %3898 = sst [smem:[#allocation14_spill]] %s3868_s0 }
   0x2   :  { %3899 = sst [smem:[#allocation15_spill]] %s3869_s1 }
   0x3   :  { %3900 = sst [smem:[#allocation16_spill]] %s3870_s2 }
   0x4   :  { %3901 = sst [smem:[#allocation17_spill]] %s3871_s3 }
   0x5   :  { %3902 = sst [smem:[#allocation18_spill]] %s3872_s4 }
   0x6   :  { %3903 = sst [smem:[#allocation19_spill]] %s3873_s5 }
   0x7   :  { %3904 = sst [smem:[#allocation20_spill]] %s3874_s6 }
   0x8   :  { %3905 = sst [smem:[#allocation21_spill]] %s3875_s7 }
   0x9   :  { %3906 = sst [smem:[#allocation22_spill]] %s3876_s8 }
   0xa   :  { %3907 = sst [smem:[#allocation23_spill]] %s3877_s9 }
   0xb   :  { %3908 = sst [smem:[#allocation24_spill]] %s3887_s19 }
   0xc   :  { %24 = vsyncpa [#allocation4], 0  ;;  %s3425_s0 = smov 0   ;;  %s3427_s30 = smov 0  }
   0xd   :  { %s3429_s20 = smov 0  }
   0xe LB: > { %3909 = sst [smem:[#allocation6_spill]] %s3305_s0  ;;  %s39_s1 = sadd.s32 1, %s3309_s30  ;;  %s3313_s20 = sphi %s3429_s20, %s30_s20   ;;  %s3309_s30 = sphi %s3427_s30, %s3950_s30   ;;  %s3305_s0 = sphi %s3425_s0, %s3949_s0  }
   0xf   : > { %3910 = sst [smem:[#allocation7_spill]] %s3309_s30  ;;  %p40_p0 = scmp.ge.s32.totalorder %s39_s1, 2 }
  0x10   : > { %3911 = sst [smem:[#allocation8_spill]] %s3313_s20  ;;  %p2823_p1 = scmp.ge.s32.totalorder %s3313_s20, 1 }
  0x11   : > { %p717_p2 = scmp.lt.s32.totalorder %s3313_s20, 3  ;;  %s3952_s1 = smov (%p40_p0, %s39_s1), 0 }
  0x12   : > { %3912 = sst [smem:[#allocation9_spill]] %s3952_s1 }
  0x13   : > { %p718_p3 = pnand %p2823_p1, %p717_p2 }
  0x15   : > { %721 = sbr.rel (%p718_p3) target bundleno = 3265 (0xcc1), region = 96 }
  0x1a   : > { %p861_p4 = scmp.lt.s32.totalorder %s3305_s0, 1  ;;  %s3913_s3 = sld [smem:[#allocation17_spill]] }
  0x1b   : > { %s3915_s4 = sld [smem:[#allocation18_spill]] }
  0x1c   : > { %s3448_s22 = scalar_select %p861_p4, %s3305_s0, 1 }
  0x1d   : > { %s3917_s5 = sld [smem:[#allocation19_spill]] }
  0x1e   : > { %s2933_s2 = sshll.u32 %s3448_s22, 5  ;;  %s2830_s23 = sshll.u32 %s3448_s22, 1 }
  0x1f   : > { %s3919_s6 = sld [smem:[#allocation20_spill]]  ;;  %s920_s24 = scalar_lea.vmem %s3885_s17, %s3448_s22 }
  0x20   : > { %s3455_s26 = scalar_lea.vmem %s3913_s3, %s2933_s2  ;;  %s3920_s7 = sld [smem:[#allocation21_spill]] }
  0x21   : > { %3914 = sst [smem:[#allocation10_spill]] %s3455_s26  ;;  %s3460_s29 = scalar_lea.vmem %s3915_s4, %s2933_s2 }
  0x22   : > { %3916 = sst [smem:[#allocation11_spill]] %s3460_s29  ;;  %s2936_s26 = sshll.u32 %s3448_s22, 4 }
  0x23   : > { %s3465_s30 = scalar_lea.vmem %s3917_s5, %s2933_s2  ;;  %s3921_s8 = sld [smem:[#allocation22_spill]] }
  0x24   : > { %3918 = sst [smem:[#allocation12_spill]] %s3465_s30  ;;  %s3508_s5 = scalar_lea.vmem %s3883_s15, %s2933_s2 }
  0x25   : > { %s3470_s0 = scalar_lea.vmem %s3919_s6, %s2830_s23  ;;  %s3923_s9 = sld [smem:[#allocation23_spill]] }
  0x26   : > { %s3475_s3 = scalar_lea.vmem %s3920_s7, %s2830_s23  ;;  %s917_s7 = scalar_lea.vmem %s3884_s16, %s3448_s22 }
  0x27   : > { %s3924_s21 = sld [smem:[#allocation6_spill]] }
  0x29   : > { %s3480_s4 = scalar_lea.vmem %s3921_s8, %s2830_s23  ;;  %s3132_s23 = smul.u32 48, %s3448_s22 }
  0x2a   : > { %3922 = sst [smem:[#allocation13_spill]] %s3480_s4  ;;  %s923_s4 = scalar_lea.vmem %s3886_s18, %s3448_s22 }
  0x2b   : > { %s3490_s19 = scalar_lea.vmem %s3923_s9, %s2936_s26  ;;  %s3513_s29 = scalar_lea.vmem %s3881_s13, %s3132_s23 }
  0x2d   : > { %p2838_p5 = scmp.ne.s32.totalorder %s3924_s21, 0 }
  0x2e   : > { %s3925_s30 = sld [smem:[#allocation14_spill]] (!%p2838_p5) }
  0x2f   : > { %929 = sbr.rel (%p2838_p5) target bundleno = 59 (0x3b), region = 100 }
  0x34   : > { %s3926_s26 = smov %s3925_s30  ;;  %v930_v0 = vld [vmem:[%s3925_s30] sm:$0xff]  ;;  %vm934_vm0 = vcmask 261120   ;;  %vm939_vm1 = vcmask 257024   ;;  %v3315_v4 = vmov 0   ;;  %vm942_vm2 = vcmask 253952  }
  0x35   : > { %v931_v1 = vld [vmem:[%s3926_s26 + $0x8] sm:$0xff]  ;;  %v932_v2 = vld [vmem:[%s3926_s26 + $0x10] sm:$0xff]  ;;  %935 = vst.msk [vmem:[#allocation3] sm:$0xff] %vm934_vm0, %v930_v0  ;;  %v933_v3 = vld [vmem:[%s3926_s26 + $0x18] sm:$0xff] }
  0x36   : > { %936 = vst.msk [vmem:[#allocation3 + $0x8] sm:$0xff] %vm934_vm0, %v931_v1  ;;  %937 = vst.msk [vmem:[#allocation3 + $0x10] sm:$0xff] %vm934_vm0, %v932_v2 }
  0x37   : > { %940 = vst.msk [vmem:[#allocation2] sm:$0xf] %vm939_vm1, %v3315_v4  ;;  %941 = vst.msk [vmem:[#allocation2 + $0x4] sm:$0xf] %vm939_vm1, %v3315_v4 }
  0x38   : > { %944 = vst.msk [vmem:[#allocation2 + $0xc] sm:$0xf] %vm939_vm1, %v3315_v4  ;;  %945 = vst.msk [vmem:[#allocation2 + $0x10] sm:$0xf] %vm939_vm1, %v3315_v4 }
  0x39   : > { %938 = vst.msk [vmem:[#allocation3 + $0x18] sm:$0xff] %vm934_vm0, %v933_v3 }
  0x3a   : > { %943 = vst.msk [vmem:[#allocation2 + $0x8] sm:$0x1] %vm942_vm2, %v3315_v4  ;;  %946 = vst.msk [vmem:[#allocation2 + $0x14] sm:$0x1] %vm942_vm2, %v3315_v4 }
  0x3b PF: > { %s3927_s9 = sld [smem:[#allocation11_spill]]  ;;  %vm982_vm3 = vcmask 261120   ;;  %v3316_v17 = vmov 0.0   ;;  %vm3317_vm4 = vmmov 0   ;;  %v2844_v20 = vld [vmem:[%s3475_s3] ss:$0 sm:$0xff]  ;;  %s3933_s27 = scalar_lea.vmem %s3878_s10, %s3448_s22 }
  0x3c   : > { %s3928_s8 = sld [smem:[#allocation10_spill]]  ;;  %v3544_v9 = vld [vmem:[#allocation3] sm:$0xff]  ;;  %vm1188_vm5 = vcmask 130048   ;;  %v2839_v32 = vld [vmem:[%s3470_s0] ss:$0 sm:$0xff]  ;;  %s3936_s25 = scalar_lea.vmem %s3880_s12, %s3448_s22  ;;  %vm2167_vm7 = vcmask 253952  }
  0x3d   : > { %s3929_s28 = sld [smem:[#allocation12_spill]]  ;;  %v3546_v10 = vld [vmem:[#allocation3 + $0x8] sm:$0xff]  ;;  %v3548_v11 = vld [vmem:[#allocation3 + $0x10] sm:$0xff]  ;;  %vm2116_vm6 = vsmask.f32 256  ;;  %vm2159_vm10 = vcmask 257024   ;;  %s3943_s2 = scalar_lea.vmem %s3882_s14, %s3448_s22 }
  0x3e   : > { %v3552_v12 = vpack.c.bf16 %v3546_v10, %v3544_v9  ;;  %s3930_s21 = sld [smem:[#allocation13_spill]]  ;;  %vm2117_vm8 = vsmask.f32 4368  ;;  %vm3754_vm9 = vmand %vm2167_vm7, %vm2116_vm6  ;;  %vm2160_vm11 = vsmask.f32 7938  ;;  %vm2238_vm14 = vcmask 1046528  }
  0x3f   : > { %s3931_s30 = sld [smem:[#allocation15_spill]]  ;;  %vm3762_vm12 = vmor %vm2116_vm6, %vm2117_vm8  ;;  %vm2203_vm15 = vsmask.f32 7424  ;;  %vm2253_vm0 = vcmask 523264   ;;  %vm2313_vm1 = vcmask 785408  }
  0x40   : > { %v3554_v13 = vld [vmem:[#allocation3 + $0x18] sm:$0xff]  ;;  %3012 = vmatprep.mubr.msk.bf16.mxu1 %vm982_vm3, %v3552_v12  ;;  %3004 = vmatprep.mubr.msk.bf16.mxu0 %vm982_vm3, %v3552_v12  ;;  %vm3769_vm13 = vmand %vm2159_vm10, %vm2160_vm11 }
  0x41   : > { %v3185_v5 = vld [vmem:[%s3927_s9 + $0x8] sm:$0xff]   ;;  %v3187_v7 = vld [vmem:[%s3927_s9] sm:$0xff]   ;;  %v3558_v14 = vpack.c.bf16 %v3554_v13, %v3548_v11 }
  0x42   : > { %v3186_v6 = vld [vmem:[%s3928_s8 + $0x8] sm:$0xff]   ;;  %3008 = vmatprep.subr.bf16.mxu1 %v3185_v5  ;;  %v3188_v8 = vld [vmem:[%s3928_s8] sm:$0xff]  }
  0x43   : > { %3009 = vmatpush3.bf16.msra.mxu1 %v3185_v5  ;;  %3000 = vmatprep.subr.bf16.mxu0 %v3186_v6  ;;  %v3189_v15 = vld [vmem:[%s3929_s28 + $0x8] sm:$0xff]   ;;  %v3190_v16 = vld [vmem:[%s3929_s28] sm:$0xff]  }
  0x44   : > { %3001 = vmatpush3.bf16.msra.mxu0 %v3186_v6  ;;  %3010 = vmatprep.subr.bf16.mxu1 %v3187_v7  ;;  %v2849_v36 = vld [vmem:[%s3930_s21] ss:$0 sm:$0xff] }
  0x45   : > { %3002 = vmatprep.subr.bf16.mxu0 %v3188_v8  ;;  %s3932_s23 = smov %s3931_s30  ;;  %v3596_v54 = vld [vmem:[%s3931_s30 + $0x1] ss:$0 sm:$0xff] }
  0x46   : > { %v3601_v58 = vld [vmem:[%s3932_s23] ss:$0 sm:$0xff] }
  0x47   : > { %3011 = vmatpush3.bf16.msra.mxu1 %v3187_v7 }
  0x48   : > { %3003 = vmatpush3.bf16.msra.mxu0 %v3188_v8  ;;  %3024 = vmatprep.subr.bf16.mxu1 %v3316_v17 }
  0x49   : > { %3016 = vmatprep.subr.bf16.mxu0 %v3189_v15 }
  0x4a   : > { %3013 = vmatmul.mubr.msk.bf16.vlgmr.msra.gmra.mxu1 %vm982_vm3, %v3558_v14 }
  0x4b   : > { %3005 = vmatmul.mubr.msk.bf16.vlgmr.msra.gmra.mxu0 %vm982_vm3, %v3558_v14  ;;  %3026 = vmatprep.mubr.msk.bf16.mxu1 %vm3317_vm4, %v3316_v17 }
  0x4c   : > { %3017 = vmatpush3.bf16.msra.mxu0 %v3189_v15  ;;  %3020 = vmatprep.mubr.msk.bf16.mxu0 %vm982_vm3, %v3552_v12 }
  0x4d   : > { %3018 = vmatprep.subr.bf16.mxu0 %v3190_v16 }
  0x50   : > { %3019 = vmatpush3.bf16.msra.mxu0 %v3190_v16 }
  0x51   : > { %3030 = vmatprep.subr.bf16.mxu0 %v3316_v17 }
  0x53   : > { %3021 = vmatmul.mubr.msk.bf16.vlgmr.msra.gmra.mxu0 %vm982_vm3, %v3558_v14 }
  0x54   : > { %3032 = vmatprep.mubr.msk.bf16.mxu0 %vm3317_vm4, %v3316_v17 }
 0x10a   : > { %v3014_v18 = vpop.f32.mrf.mxu1 }
 0x10b   : > { %v3006_v19 = vpop.f32.mrf.mxu0  ;;  %v1106_v24 = vadd.f32 %v3014_v18, %v2844_v20 }
 0x10c   : > { %v1097_v21 = vpop.f32.mrf.mxu1  ;;  %v1032_v37 = vadd.f32 %v3006_v19, %v2839_v32 }
 0x10d   : > { %v1023_v22 = vpop.f32.mrf.mxu0  ;;  %v1098_v28 = vadd.f32 %v2844_v20, %v1097_v21 }
 0x10e   : > { %v3015_v23 = vpop.f32.mrf.mxu1  ;;  %v1024_v42 = vadd.f32 %v2839_v32, %v1023_v22 }
 0x10f   : > { %v1109_v25 = vadd.f32 %v3015_v23, %v2844_v20  ;;  %v3007_v26 = vpop.f32.mrf.mxu0 }
 0x110   : > { %v1100_v27 = vpop.f32.mrf.mxu1  ;;  %v1035_v38 = vadd.f32 %v3007_v26, %v2839_v32 }
 0x111   : > { %v1113_v29 = vpack.c.bf16 %v1109_v25, %v1106_v24  ;;  %v1101_v30 = vadd.f32 %v2844_v20, %v1100_v27  ;;  %v1026_v31 = vpop.f32.mrf.mxu0 }
 0x112   : > { %v1027_v43 = vadd.f32 %v2839_v32, %v1026_v31  ;;  %v1039_v47 = vpack.c.bf16 %v1035_v38, %v1032_v37  ;;  %v3191_v38 = vld [vmem:[%s3927_s9 + $0x18] sm:$0xff]  }
 0x113   : > { %v1112_v33 = vpack.c.bf16 %v1101_v30, %v1098_v28  ;;  %v1240_v34 = vsel %vm1188_vm5, %v1113_v29, 0  ;;  %v3022_v35 = vpop.f32.mrf.mxu0 }
 0x114   : > { %3031 = vmatpush3.bf16.xpose.msra.mxu0 %v1240_v34  ;;  %v1180_v41 = vadd.f32 %v3022_v35, %v2849_v36  ;;  %v1038_v51 = vpack.c.bf16 %v1027_v43, %v1024_v42 }
 0x115   : > { %v1193_v39 = vsel %vm1188_vm5, %v1112_v33, 0  ;;  %v1171_v40 = vpop.f32.mrf.mxu0  ;;  %3042 = vmatprep.subr.bf16.mxu0 %v3316_v17 }
 0x116   : > { %3025 = vmatpush3.bf16.xpose.msra.mxu1 %v1193_v39  ;;  %v1172_v45 = vadd.f32 %v2849_v36, %v1171_v40  ;;  %v3192_v39 = vld [vmem:[%s3928_s8 + $0x18] sm:$0xff]  }
 0x117   : > { %v3023_v44 = vpop.f32.mrf.mxu0  ;;  %3036 = vmatprep.subr.bf16.mxu1 %v3316_v17 }
 0x118   : > { %v1183_v46 = vadd.f32 %v3023_v44, %v2849_v36 }
 0x119   : > { %v1174_v48 = vpop.f32.mrf.mxu0 }
 0x11a   : > { %v1187_v49 = vpack.c.bf16 %v1183_v46, %v1180_v41  ;;  %v1175_v50 = vadd.f32 %v2849_v36, %v1174_v48 }
 0x11b   : > { %3033 = vmatmul.mubr.msk.bf16.vlgmr.msra.gmra.mxu0 %vm1188_vm5, %v1039_v47 }
 0x11c   : > { %v1186_v52 = vpack.c.bf16 %v1175_v50, %v1172_v45  ;;  %3043 = vmatpush3.bf16.msra.mxu0 %v1187_v49  ;;  %3044 = vmatprep.mubr.msk.bf16.mxu0 %vm3317_vm4, %v3316_v17 }
 0x11d   : > { %3027 = vmatmul.mubr.msk.bf16.vlgmr.msra.gmra.mxu1 %vm1188_vm5, %v1038_v51  ;;  %3056 = vmatprep.subr.bf16.mxu0 %v3191_v38  ;;  %v3193_v51 = vld [vmem:[%s3927_s9 + $0x10] sm:$0xff]   ;;  %s3320_s9 = smov 64  }
 0x11e   : > { %3037 = vmatpush3.bf16.msra.mxu1 %v1186_v52  ;;  %3038 = vmatprep.mubr.msk.bf16.mxu1 %vm3317_vm4, %v3316_v17 }
 0x11f   : > { %3048 = vmatprep.subr.bf16.mxu1 %v3192_v39 }
 0x1db   : > { %v1276_v53 = vpop.f32.mrf.mxu0 }
 0x1dc   : > { %v1285_v55 = vmul.f32 0.25, %v1276_v53 }
 0x1dd   : > { %v1229_v56 = vpop.f32.mrf.mxu1  ;;  %v3034_v57 = vpop.f32.mrf.mxu0 }
 0x1de   : > { %v1283_v59 = vmul.f32 0.25, %v1229_v56  ;;  %v1301_v60 = vadd.f32 %v3596_v54, %v1285_v55  ;;  %v3194_v56 = vld [vmem:[%s3928_s8 + $0x10] sm:$0xff]   ;;  %v3195_v57 = vld [vmem:[%s3929_s28 + $0x18] sm:$0xff]   ;;  %s3934_s8 = sld [smem:[#allocation16_spill]] }
 0x1df   : > { %v3028_v61 = vpop.f32.mrf.mxu1  ;;  %v1279_v62 = vpop.f32.mrf.mxu0 }
 0x1e0   : > { %v1286_v63 = vmul.f32 0.25, %v1279_v62  ;;  %v1309_v0 = vsel %vm1188_vm5, %v1301_v60, -inf  ;;  %v1299_v1 = vadd.f32 %v3601_v58, %v1283_v59  ;;  %v3196_v59 = vld [vmem:[%s3929_s28 + $0x10] sm:$0xff]  }
 0x1e1   : > { %1310 = vmax.xlane.f32.xlu0 %v1309_v0  ;;  %v1232_v2 = vpop.f32.mrf.mxu1  ;;  %v3035_v3 = vpop.f32.mrf.mxu0 }
 0x1e2   : > { %v1284_v4 = vmul.f32 0.25, %v1232_v2  ;;  %v1303_v5 = vsel %vm1188_vm5, %v1299_v1, -inf  ;;  %v1302_v6 = vadd.f32 %v3596_v54, %v1286_v63 }
 0x1e3   : > { %1304 = vmax.xlane.f32.xlu1 %v1303_v5  ;;  %v3029_v7 = vpop.f32.mrf.mxu1 }
 0x1e4   : > { %v1312_v8 = vsel %vm1188_vm5, %v1302_v6, -inf  ;;  %v1300_v15 = vadd.f32 %v3601_v58, %v1284_v4  ;;  %v2875_v4 = vld [vmem:[%s3475_s3 + $0x1] ss:$0 sm:$0xff]  ;;  %s3935_s3 = scalar_lea.vmem %s3879_s11, %s3448_s22 }
 0x1e5   : > { %1313 = vmax.xlane.f32.xlu0 %v1312_v8 }
 0x1e6   : > { %v1306_v16 = vsel %vm1188_vm5, %v1300_v15, -inf }
 0x1e7   : > { %1307 = vmax.xlane.f32.xlu1 %v1306_v16 }
 0x26a   : > { %v1311_v18 = vpop.xlane.xlu0 %1310 }
 0x26b   : > { %v1317_v19 = vsub.f32 %v1301_v60, %v1311_v18 }
 0x26c   : > { %v1305_v20 = vpop.xlane.xlu1 %1304 }
 0x26d   : > { %v1323_v21 = vmul.f32 1.442695, %v1317_v19  ;;  %v1315_v22 = vsub.f32 %v1299_v1, %v1305_v20 }
 0x26e   : > { %v1314_v23 = vpop.xlane.xlu0 %1313 }
 0x26f   : > { %3215 = vpow2.f32 %v1323_v21  ;;  %v1319_v24 = vmul.f32 1.442695, %v1315_v22  ;;  %v1318_v25 = vsub.f32 %v1302_v6, %v1314_v23  ;;  %v2865_v22 = vld [vmem:[%s3470_s0 + $0x1] ss:$0 sm:$0xff]  ;;  %s3318_s0 = smov 16  }
 0x270   : > { %v1308_v26 = vpop.xlane.xlu1 %1307 }
 0x271   : > { %3217 = vpow2.f32 %v1319_v24  ;;  %v1325_v27 = vmul.f32 1.442695, %v1318_v25  ;;  %v1316_v28 = vsub.f32 %v1300_v15, %v1308_v26 }
 0x273   : > { %3219 = vpow2.f32 %v1325_v27  ;;  %v1321_v29 = vmul.f32 1.442695, %v1316_v28 }
 0x275   : > { %3221 = vpow2.f32 %v1321_v29 }
 0x27c   : > { %v3216_v30 = vpop.eup %3215 }
 0x27d   : > { %v1333_v31 = vsel %vm1188_vm5, %v3216_v30, 0.0 }
 0x27e   : > { %v3218_v32 = vpop.eup %3217  ;;  %1334 = vadd.xlane.f32.xlu0 %v1333_v31 }
 0x27f   : > { %v1327_v34 = vsel %vm1188_vm5, %v3218_v32, 0.0 }
 0x280   : > { %v3220_v33 = vpop.eup %3219 }
 0x281   : > { %v1336_v35 = vsel %vm1188_vm5, %v3220_v33, 0.0 }
 0x282   : > { %v3222_v36 = vpop.eup %3221  ;;  %1328 = vadd.xlane.f32.xlu0 %v1327_v34  ;;  %1337 = vadd.xlane.f32.xlu1 %v1336_v35  ;;  %v2885_v34 = vld [vmem:[%s3930_s21 + $0x1] ss:$0 sm:$0xff] }
 0x283   : > { %v1330_v37 = vsel %vm1188_vm5, %v3222_v36, 0.0 }
 0x286   : > { %1331 = vadd.xlane.f32.xlu1 %v1330_v37 }
 0x307   : > { %v1335_v40 = vpop.xlane.xlu0 %1334 }
 0x308   : > { %3223 = vrcp.f32 %v1335_v40 }
 0x30b   : > { %v1329_v41 = vpop.xlane.xlu0 %1328  ;;  %v1338_v42 = vpop.xlane.xlu1 %1337 }
 0x30c   : > { %3225 = vrcp.f32 %v1338_v42 }
 0x30d   : > { %3227 = vrcp.f32 %v1329_v41 }
 0x30f   : > { %v1332_v43 = vpop.xlane.xlu1 %1331 }
 0x310   : > { %3229 = vrcp.f32 %v1332_v43 }
 0x315   : > { %v3224_v44 = vpop.eup %3223 }
 0x316   : > { %v1345_v47 = vmul.f32 %v3224_v44, %v3216_v30 }
 0x319   : > { %v3226_v45 = vpop.eup %3225 }
 0x31a   : > { %v3228_v46 = vpop.eup %3227  ;;  %v1346_v48 = vmul.f32 %v3226_v45, %v3220_v33 }
 0x31b   : > { %v1343_v52 = vmul.f32 %v3228_v46, %v3218_v32 }
 0x31c   : > { %v1348_v50 = vpack.c.bf16 %v1346_v48, %v1345_v47 }
 0x31d   : > { %v3230_v49 = vpop.eup %3229 }
 0x31e   : > { %v1344_v53 = vmul.f32 %v3230_v49, %v3222_v36  ;;  %3045 = vmatmul.mubr.msk.bf16.vlgmr.msra.gmra.mxu0 %vm1188_vm5, %v1348_v50 }
 0x31f   : > { %3057 = vmatpush3.bf16.msra.mxu0 %v3191_v38  ;;  %3060 = vmatprep.mubr.msk.bf16.mxu0 %vm982_vm3, %v3552_v12 }
 0x320   : > { %v1347_v55 = vpack.c.bf16 %v1344_v53, %v1343_v52  ;;  %3058 = vmatprep.subr.bf16.mxu0 %v3193_v51 }
 0x322   : > { %3039 = vmatmul.mubr.msk.bf16.vlgmr.msra.gmra.mxu1 %vm1188_vm5, %v1347_v55 }
 0x323   : > { %3049 = vmatpush3.bf16.msra.mxu1 %v3192_v39  ;;  %3052 = vmatprep.mubr.msk.bf16.mxu1 %vm982_vm3, %v3552_v12 }
 0x324   : > { %3059 = vmatpush3.bf16.msra.mxu0 %v3193_v51  ;;  %3050 = vmatprep.subr.bf16.mxu1 %v3194_v56 }
 0x325   : > { %3072 = vmatprep.subr.bf16.mxu0 %v3316_v17 }
 0x327   : > { %3061 = vmatmul.mubr.msk.bf16.vlgmr.msra.gmra.mxu0 %vm982_vm3, %v3558_v14  ;;  %3051 = vmatpush3.bf16.msra.mxu1 %v3194_v56 }
 0x328   : > { %3074 = vmatprep.mubr.msk.bf16.mxu0 %vm3317_vm4, %v3316_v17  ;;  %3064 = vmatprep.subr.bf16.mxu1 %v3195_v57 }
 0x32a   : > { %3053 = vmatmul.mubr.msk.bf16.vlgmr.msra.gmra.mxu1 %vm982_vm3, %v3558_v14 }
 0x32b   : > { %3068 = vmatprep.mubr.msk.bf16.mxu1 %vm982_vm3, %v3552_v12  ;;  %3065 = vmatpush3.bf16.msra.mxu1 %v3195_v57 }
 0x32c   : > { %3066 = vmatprep.subr.bf16.mxu1 %v3196_v59 }
 0x32f   : > { %3067 = vmatpush3.bf16.msra.mxu1 %v3196_v59 }
 0x330   : > { %3078 = vmatprep.subr.bf16.mxu1 %v3316_v17 }
 0x332   : > { %3069 = vmatmul.mubr.msk.bf16.vlgmr.msra.gmra.mxu1 %vm982_vm3, %v3558_v14 }
 0x333   : > { %3080 = vmatprep.mubr.msk.bf16.mxu1 %vm3317_vm4, %v3316_v17 }
 0x3de   : > { %v3641_v60 = vpop.f32.mrf.mxu0 }
 0x3e0   : > { %v3046_v61 = vpop.f32.mrf.mxu0 }
 0x3e2   : > { %v3643_v62 = vpop.f32.mrf.mxu1  ;;  %v3645_v12 = vpop.f32.mrf.mxu0 }
 0x3e4   : > { %v3040_v63 = vpop.f32.mrf.mxu1  ;;  %v3047_v0 = vpop.f32.mrf.mxu0 }
 0x3e6   : > { %v3647_v1 = vpop.f32.mrf.mxu1 }
 0x3e7   : > { %v3062_v2 = vpop.f32.mrf.mxu0 }
 0x3e8   : > { %v3041_v3 = vpop.f32.mrf.mxu1  ;;  %v1581_v7 = vadd.f32 %v3062_v2, %v2875_v4 }
 0x3e9   : > { %v1572_v5 = vpop.f32.mrf.mxu0 }
 0x3ea   : > { %v3054_v14 = vpop.f32.mrf.mxu1  ;;  %v1573_v18 = vadd.f32 %v2875_v4, %v1572_v5 }
 0x3eb   : > { %v3063_v6 = vpop.f32.mrf.mxu0  ;;  %v1505_v26 = vadd.f32 %v3054_v14, %v2865_v22 }
 0x3ec   : > { %v1584_v8 = vadd.f32 %v3063_v6, %v2875_v4  ;;  %v1496_v15 = vpop.f32.mrf.mxu1 }
 0x3ed   : > { %v1575_v16 = vpop.f32.mrf.mxu0  ;;  %v1497_v30 = vadd.f32 %v2865_v22, %v1496_v15 }
 0x3ee   : > { %v1588_v19 = vpack.c.bf16 %v1584_v8, %v1581_v7  ;;  %v1576_v20 = vadd.f32 %v2875_v4, %v1575_v16  ;;  %v3055_v21 = vpop.f32.mrf.mxu1 }
 0x3ef   : > { %v1508_v27 = vadd.f32 %v3055_v21, %v2865_v22 }
 0x3f0   : > { %v1587_v23 = vpack.c.bf16 %v1576_v20, %v1573_v18  ;;  %v1716_v24 = vsel %vm1188_vm5, %v1588_v19, 0  ;;  %v1499_v25 = vpop.f32.mrf.mxu1 }
 0x3f1   : > { %3079 = vmatpush3.bf16.xpose.msra.mxu1 %v1716_v24  ;;  %v1500_v29 = vadd.f32 %v2865_v22, %v1499_v25  ;;  %v1512_v31 = vpack.c.bf16 %v1508_v27, %v1505_v26 }
 0x3f2   : > { %v1669_v28 = vsel %vm1188_vm5, %v1587_v23, 0  ;;  %3090 = vmatprep.subr.bf16.mxu1 %v3316_v17  ;;  %v3070_v33 = vpop.f32.mrf.mxu1 }
 0x3f3   : > { %3073 = vmatpush3.bf16.xpose.msra.mxu0 %v1669_v28  ;;  %v1511_v32 = vpack.c.bf16 %v1500_v29, %v1497_v30  ;;  %v1657_v36 = vadd.f32 %v3070_v33, %v2885_v34 }
 0x3f4   : > { %3084 = vmatprep.subr.bf16.mxu0 %v3316_v17  ;;  %v1648_v35 = vpop.f32.mrf.mxu1 }
 0x3f5   : > { %v1649_v38 = vadd.f32 %v2885_v34, %v1648_v35 }
 0x3f6   : > { %v3071_v37 = vpop.f32.mrf.mxu1 }
 0x3f7   : > { %v1660_v39 = vadd.f32 %v3071_v37, %v2885_v34 }
 0x3f8   : > { %3081 = vmatmul.mubr.msk.bf16.vlgmr.msra.gmra.mxu1 %vm1188_vm5, %v1512_v31  ;;  %v1651_v40 = vpop.f32.mrf.mxu1 }
 0x3f9   : > { %3092 = vmatprep.mubr.msk.bf16.mxu1 %vm3317_vm4, %v3316_v17  ;;  %v1664_v41 = vpack.c.bf16 %v1660_v39, %v1657_v36  ;;  %v1652_v42 = vadd.f32 %v2885_v34, %v1651_v40 }
 0x3fa   : > { %3075 = vmatmul.mubr.msk.bf16.vlgmr.msra.gmra.mxu0 %vm1188_vm5, %v1511_v32 }
 0x3fb   : > { %3086 = vmatprep.mubr.msk.bf16.mxu0 %vm3317_vm4, %v3316_v17  ;;  %v1663_v43 = vpack.c.bf16 %v1652_v42, %v1649_v38  ;;  %3091 = vmatpush3.bf16.msra.mxu1 %v1664_v41  ;;  %v3197_v42 = vld [vmem:[%s3490_s19 + $0x8] sm:$0xff]  }
 0x3fd   : > { %3085 = vmatpush3.bf16.msra.mxu0 %v1663_v43  ;;  %v3198_v43 = vld [vmem:[%s3490_s19] sm:$0xff]  }
 0x3fe   : > { %3096 = vmatprep.subr.bf16.mxu0 %v3197_v42 }
 0x4b8   : > { %v1752_v44 = vpop.f32.mrf.mxu1 }
 0x4b9   : > { %v1761_v47 = vmul.f32 0.25, %v1752_v44 }
 0x4ba   : > { %v1705_v45 = vpop.f32.mrf.mxu0  ;;  %v3082_v46 = vpop.f32.mrf.mxu1 }
 0x4bb   : > { %v1759_v48 = vmul.f32 0.25, %v1705_v45  ;;  %v1765_v57 = vadd.f32 %v3596_v54, %v1761_v47 }
 0x4bc   : > { %v3076_v49 = vpop.f32.mrf.mxu0  ;;  %v1755_v17 = vpop.f32.mrf.mxu1 }
 0x4bd   : > { %v1763_v50 = vadd.f32 %v3601_v58, %v1759_v48  ;;  %v1762_v53 = vmul.f32 0.25, %v1755_v17  ;;  %v1773_v63 = vsel %vm1188_vm5, %v1765_v57, -inf }
 0x4be   : > { %v1708_v51 = vpop.f32.mrf.mxu0  ;;  %v3083_v52 = vpop.f32.mrf.mxu1 }
 0x4bf   : > { %v1760_v55 = vmul.f32 0.25, %v1708_v51  ;;  %v1767_v56 = vsel %vm1188_vm5, %v1763_v50, -inf  ;;  %v1766_v2 = vadd.f32 %v3596_v54, %v1762_v53 }
 0x4c0   : > { %1768 = vmax.xlane.f32.xlu0 %v1767_v56  ;;  %v3077_v59 = vpop.f32.mrf.mxu0 }
 0x4c1   : > { %v1764_v61 = vadd.f32 %v3601_v58, %v1760_v55  ;;  %v1776_v3 = vsel %vm1188_vm5, %v1766_v2, -inf }
 0x4c3   : > { %v1770_v0 = vsel %vm1188_vm5, %v1764_v61, -inf }
 0x4c4   : > { %1774 = vmax.xlane.f32.xlu0 %v1773_v63  ;;  %1771 = vmax.xlane.f32.xlu1 %v1770_v0 }
 0x4c8   : > { %1777 = vmax.xlane.f32.xlu1 %v1776_v3 }
 0x549   : > { %v1769_v4 = vpop.xlane.xlu0 %1768 }
 0x54a   : > { %v1779_v5 = vsub.f32 %v1763_v50, %v1769_v4 }
 0x54c   : > { %v1783_v14 = vmul.f32 1.442695, %v1779_v5 }
 0x54d   : > { %v1775_v6 = vpop.xlane.xlu0 %1774  ;;  %v1772_v7 = vpop.xlane.xlu1 %1771 }
 0x54e   : > { %3231 = vpow2.f32 %v1783_v14  ;;  %v1781_v8 = vsub.f32 %v1765_v57, %v1775_v6  ;;  %v1780_v15 = vsub.f32 %v1764_v61, %v1772_v7  ;;  %v3319_v14 = vmov 0  }
 0x54f   : > { %3184 = vset.pattern.permute.xlu1 %v3319_v14  ;;  %3183 = vset.pattern.permute.xlu0 %v3319_v14 }
 0x550   : > { %v1787_v58 = vmul.f32 1.442695, %v1781_v8  ;;  %v1785_v16 = vmul.f32 1.442695, %v1780_v15 }
 0x551   : > { %v1778_v18 = vpop.xlane.xlu1 %1777 }
 0x552   : > { %3233 = vpow2.f32 %v1787_v58  ;;  %v1782_v19 = vsub.f32 %v1766_v2, %v1778_v18 }
 0x553   : > { %3235 = vpow2.f32 %v1785_v16 }
 0x554   : > { %v1789_v54 = vmul.f32 1.442695, %v1782_v19 }
 0x556   : > { %3237 = vpow2.f32 %v1789_v54 }
 0x55b   : > { %v3232_v20 = vpop.eup %3231 }
 0x55c   : > { %v1791_v21 = vsel %vm1188_vm5, %v3232_v20, 0.0 }
 0x55d   : > { %1792 = vadd.xlane.f32.xlu0 %v1791_v21 }
 0x55f   : > { %v3234_v22 = vpop.eup %3233 }
 0x560   : > { %v3236_v23 = vpop.eup %3235  ;;  %v1797_v24 = vsel %vm1188_vm5, %v3234_v22, 0.0 }
 0x561   : > { %1798 = vadd.xlane.f32.xlu0 %v1797_v24  ;;  %v1794_v25 = vsel %vm1188_vm5, %v3236_v23, 0.0 }
 0x562   : > { %1795 = vadd.xlane.f32.xlu1 %v1794_v25 }
 0x563   : > { %v3238_v26 = vpop.eup %3237 }
 0x564   : > { %v1800_v27 = vsel %vm1188_vm5, %v3238_v26, 0.0 }
 0x566   : > { %1801 = vadd.xlane.f32.xlu1 %v1800_v27 }
 0x5e6   : > { %v1793_v28 = vpop.xlane.xlu0 %1792 }
 0x5e7   : > { %3239 = vrcp.f32 %v1793_v28 }
 0x5ea   : > { %v1799_v29 = vpop.xlane.xlu0 %1798 }
 0x5eb   : > { %v1796_v30 = vpop.xlane.xlu1 %1795 }
 0x5ec   : > { %3241 = vrcp.f32 %v1796_v30 }
 0x5ed   : > { %3243 = vrcp.f32 %v1799_v29 }
 0x5ef   : > { %v1802_v31 = vpop.xlane.xlu1 %1801 }
 0x5f0   : > { %3245 = vrcp.f32 %v1802_v31 }
 0x5f4   : > { %v3240_v32 = vpop.eup %3239 }
 0x5f5   : > { %v1807_v34 = vmul.f32 %v3240_v32, %v3232_v20 }
 0x5f9   : > { %v3242_v33 = vpop.eup %3241 }
 0x5fa   : > { %v1808_v35 = vmul.f32 %v3242_v33, %v3236_v23  ;;  %v3244_v36 = vpop.eup %3243  ;;  %v956_v23 = vld [vmem:[%s3934_s8 + $0x8] sm:$0xff] }
 0x5fb   : > { %v1809_v39 = vmul.f32 %v3244_v36, %v3234_v22 }
 0x5fc   : > { %v1811_v37 = vpack.c.bf16 %v1808_v35, %v1807_v34 }
 0x5fd   : > { %v3246_v38 = vpop.eup %3245 }
 0x5fe   : > { %3087 = vmatmul.mubr.msk.bf16.vlgmr.msra.gmra.mxu0 %vm1188_vm5, %v1811_v37  ;;  %v1810_v40 = vmul.f32 %v3246_v38, %v3238_v26 }
 0x5ff   : > { %3097 = vmatpush3.bf16.msra.mxu0 %v3197_v42  ;;  %v958_v42 = vld [vmem:[%s3934_s8 + $0x18] sm:$0xff] }
 0x600   : > { %v1812_v41 = vpack.c.bf16 %v1810_v40, %v1809_v39  ;;  %3098 = vmatprep.subr.bf16.mxu0 %v3198_v43 }
 0x602   : > { %3093 = vmatmul.mubr.msk.bf16.vlgmr.msra.gmra.mxu1 %vm1188_vm5, %v1812_v41 }
 0x603   : > { %3099 = vmatpush3.bf16.msra.mxu0 %v3198_v43  ;;  %v955_v43 = vld [vmem:[%s3934_s8] sm:$0xff] }
 0x6be   : > { %v1850_v44 = vpop.f32.mrf.mxu0 }
 0x6c0   : > { %v3088_v45 = vpop.f32.mrf.mxu0 }
 0x6c1   : > { %v3206_v45 = vld [vmem:[%s3513_s29 + $0x20] sm:$0xff]  }
 0x6c2   : > { %v1853_v46 = vpop.f32.mrf.mxu0  ;;  %v1894_v47 = vpop.f32.mrf.mxu1 }
 0x6c3   : > { %v3173_v48 = vpack.i.bf16 %v1853_v46, %v1850_v44  ;;  %v3205_v44 = vld [vmem:[%s3513_s29 + $0x28] sm:$0xff]   ;;  %v3207_v46 = vld [vmem:[%s3513_s29 + $0x18] sm:$0xff]  }
 0x6c4   : > { %v3089_v49 = vpop.f32.mrf.mxu0  ;;  %v3094_v17 = vpop.f32.mrf.mxu1  ;;  %3104 = vmatprep.subr.bf16.mxu1 %v3205_v44 }
 0x6c5   : > { %3174 = vrot.lane.b32.xlu0 %v3173_v48, %s3318_s0  ;;  %3105 = vmatpush3.bf16.msra.mxu1 %v3205_v44 }
 0x6c6   : > { %v1897_v50 = vpop.f32.mrf.mxu1  ;;  %3106 = vmatprep.subr.bf16.mxu1 %v3206_v45 }
 0x6c7   : > { %v3178_v51 = vpack.i.bf16 %v1897_v50, %v1894_v47 }
 0x6c8   : > { %v3095_v52 = vpop.f32.mrf.mxu1 }
 0x6c9   : > { %3179 = vrot.lane.b32.xlu1 %v3178_v51, %s3318_s0  ;;  %3107 = vmatpush3.bf16.msra.mxu1 %v3206_v45  ;;  %s3944_s0 = sld [smem:[#allocation8_spill]] }
 0x6ca   : > { %3108 = vmatprep.subr.bf16.mxu1 %v3207_v46 }
 0x6cd   : > { %3109 = vmatpush3.bf16.msra.mxu1 %v3207_v46 }
 0x737   : > { %v3175_v53 = vpop.permute.xlu0 %3174 }
 0x738   : > { %v3177_v55 = vunpack.i.h.bf16 %v3175_v53  ;;  %v3176_v56 = vunpack.i.l.bf16 %v3175_v53 }
 0x73a   : > { %v1918_v57 = vsel %vm1188_vm5, %v3647_v1, %v3177_v55  ;;  %v1917_v59 = vsel %vm1188_vm5, %v3643_v62, %v3176_v56  ;;  %v2894_v62 = vld [vmem:[%s3933_s27] ss:$0 sm:$0xff] }
 0x73b   : > { %v1921_v61 = vpack.c.bf16 %v1918_v57, %v1917_v59  ;;  %v3180_v63 = vpop.permute.xlu1 %3179 }
 0x73c   : > { %v3182_v0 = vunpack.i.h.bf16 %v3180_v63  ;;  %v3181_v2 = vunpack.i.l.bf16 %v3180_v63 }
 0x73d   : > { %3100 = vmatprep.mubr.msk.bf16.mxu0 %vm982_vm3, %v1921_v61 }
 0x73e   : > { %v1920_v3 = vsel %vm1188_vm5, %v3645_v12, %v3182_v0  ;;  %v1919_v4 = vsel %vm1188_vm5, %v3641_v60, %v3181_v2  ;;  %v2899_v2 = vld [vmem:[%s3935_s3] ss:$0 sm:$0xff] }
 0x73f   : > { %v1922_v5 = vpack.c.bf16 %v1920_v3, %v1919_v4  ;;  %v2900_v4 = vld [vmem:[%s3936_s25] ss:$0 sm:$0xff] }
 0x741   : > { %3101 = vmatmul.mubr.msk.bf16.vlgmr.msra.gmra.mxu0 %vm982_vm3, %v1922_v5 }
 0x801   : > { %v3102_v1 = vpop.f32.mrf.mxu0 }
 0x802   : > { %v1995_v60 = vadd.f32 %v3102_v1, %v2894_v62 }
 0x803   : > { %v1986_v6 = vpop.f32.mrf.mxu0 }
 0x804   : > { %v1987_v7 = vadd.f32 %v2894_v62, %v1986_v6  ;;  %v2003_v22 = vadd.f32 %v1995_v60, %v3548_v11 }
 0x805   : > { %v3103_v8 = vpop.f32.mrf.mxu0 }
 0x806   : > { %v1998_v15 = vadd.f32 %v3103_v8, %v2894_v62  ;;  %v2001_v12 = vadd.f32 %v1987_v7, %v3544_v9  ;;  %v2013_v9 = vsel %vm982_vm3, %v2003_v22, 0.0 }
 0x807   : > { %v1989_v58 = vpop.f32.mrf.mxu0 }
 0x808   : > { %v1990_v16 = vadd.f32 %v2894_v62, %v1989_v58  ;;  %v2007_v18 = vsel %vm982_vm3, %v2001_v12, 0.0  ;;  %v2004_v19 = vadd.f32 %v1998_v15, %v3554_v13 }
 0x809   : > { %2008 = vadd.xlane.f32.xlu1 %v2007_v18 }
 0x80a   : > { %v2002_v54 = vadd.f32 %v1990_v16, %v3546_v10  ;;  %v2016_v21 = vsel %vm982_vm3, %v2004_v19, 0.0  ;;  %v957_v10 = vld [vmem:[%s3934_s8 + $0x10] sm:$0xff] }
 0x80c   : > { %v2010_v20 = vsel %vm982_vm3, %v2002_v54, 0.0 }
 0x80d   : > { %2011 = vadd.xlane.f32.xlu0 %v2010_v20  ;;  %2017 = vadd.xlane.f32.xlu1 %v2016_v21 }
 0x811   : > { %2014 = vadd.xlane.f32.xlu0 %v2013_v9 }
 0x81e   : > { %2087 = vperm.xlu1 %3184, %v956_v23  }
 0x822   : > { %2092 = vperm.xlu1 %3184, %v957_v10  }
 0x892   : > { %v2009_v13 = vpop.xlane.xlu1 %2008 }
 0x893   : > { %v2020_v27 = vmul.f32 0.03125, %v2009_v13 }
 0x895   : > { %v2024_v33 = vsub.f32 %v2001_v12, %v2020_v27 }
 0x896   : > { %v2012_v24 = vpop.xlane.xlu0 %2011  ;;  %v2018_v25 = vpop.xlane.xlu1 %2017 }
 0x897   : > { %v2021_v26 = vmul.f32 0.03125, %v2012_v24  ;;  %v2023_v11 = vmul.f32 0.03125, %v2018_v25  ;;  %v2028_v40 = vmul.f32 %v2024_v33, %v2024_v33 }
 0x899   : > { %v2025_v28 = vsub.f32 %v2002_v54, %v2021_v26  ;;  %v2027_v29 = vsub.f32 %v2004_v19, %v2023_v11  ;;  %v2032_v41 = vsel %vm982_vm3, %v2028_v40, 0.0  ;;  %v2176_v11 = vld [vmem:[#allocation2 + $0x14] sm:$0x1]  ;;  %v3211_v26 = vld [vmem:[%s3508_s5 + $0x18] sm:$0xff]  }
 0x89a   : > { %v2015_v30 = vpop.xlane.xlu0 %2014  ;;  %v3720_v47 = vpop.permute.xlu1 %2087  ;;  %3120 = vmatprep.subr.bf16.mxu0 %v3211_v26 }
 0x89b   : > { %v2022_v31 = vmul.f32 0.03125, %v2015_v30  ;;  %v2031_v32 = vmul.f32 %v2027_v29, %v2027_v29  ;;  %v2029_v36 = vmul.f32 %v2025_v28, %v2025_v28  ;;  %3121 = vmatpush3.bf16.msra.mxu0 %v3211_v26 }
 0x89d   : > { %v2026_v34 = vsub.f32 %v2003_v22, %v2022_v31  ;;  %v2041_v35 = vsel %vm982_vm3, %v2031_v32, 0.0  ;;  %v2035_v39 = vsel %vm982_vm3, %v2029_v36, 0.0 }
 0x89e   : > { %2042 = vadd.xlane.f32.xlu1 %v2041_v35  ;;  %v3722_v48 = vpop.permute.xlu1 %2092 }
 0x89f   : > { %v2030_v37 = vmul.f32 %v2026_v34, %v2026_v34 }
 0x8a1   : > { %v2038_v38 = vsel %vm982_vm3, %v2030_v37, 0.0 }
 0x8a2   : > { %2039 = vadd.xlane.f32.xlu0 %v2038_v38  ;;  %2036 = vadd.xlane.f32.xlu1 %v2035_v39  ;;  %v2172_v38 = vld [vmem:[#allocation2 + $0xc] sm:$0xf] }
 0x8a6   : > { %2033 = vadd.xlane.f32.xlu0 %v2032_v41 }
 0x8b3   : > { %2097 = vperm.xlu1 %3184, %v958_v42   ;;  %v2169_v42 = vld [vmem:[#allocation2 + $0x8] sm:$0x1] }
 0x8bc   : > { %2082 = vperm.xlu0 %3183, %v955_v43  }
 0x927   : > { %v2043_v49 = vpop.xlane.xlu1 %2042 }
 0x928   : > { %v2047_v17 = vmul.f32 0.03125, %v2043_v49 }
 0x92a   : > { %v2051_v50 = vadd.f32 1e-05, %v2047_v17 }
 0x92b   : > { %v2040_v51 = vpop.xlane.xlu0 %2039  ;;  %v2037_v52 = vpop.xlane.xlu1 %2036 }
 0x92c   : > { %3247 = vrsqrt.f32 %v2051_v50  ;;  %v2046_v53 = vmul.f32 0.03125, %v2040_v51  ;;  %v2045_v55 = vmul.f32 0.03125, %v2037_v52 }
 0x92e   : > { %v2050_v56 = vadd.f32 1e-05, %v2046_v53  ;;  %v2049_v57 = vadd.f32 1e-05, %v2045_v55  ;;  %v2162_v53 = vld [vmem:[#allocation2] sm:$0xf] }
 0x92f   : > { %v2034_v59 = vpop.xlane.xlu0 %2033  ;;  %v3734_v8 = vpop.permute.xlu1 %2097 }
 0x930   : > { %3249 = vrsqrt.f32 %v2050_v56  ;;  %v2044_v61 = vmul.f32 0.03125, %v2034_v59 }
 0x931   : > { %3251 = vrsqrt.f32 %v2049_v57 }
 0x932   : > { %v2048_v63 = vadd.f32 1e-05, %v2044_v61 }
 0x934   : > { %3253 = vrsqrt.f32 %v2048_v63  ;;  %v3208_v63 = vld [vmem:[%s3513_s29 + $0x10] sm:$0xff]  }
 0x935   : > { %3110 = vmatprep.subr.bf16.mxu1 %v3208_v63 }
 0x936   : > { %3111 = vmatpush3.bf16.msra.mxu1 %v3208_v63 }
 0x937   : > { %v3749_v24 = vpop.permute.xlu0 %2082 }
 0x939   : > { %v3248_v0 = vpop.eup %3247 }
 0x93a   : > { %v2059_v3 = vmul.f32 %v3248_v0, %v2027_v29 }
 0x93c   : > { %v2069_v5 = vmul.f32 %v2899_v2, %v2059_v3 }
 0x93d   : > { %v3250_v14 = vpop.eup %3249 }
 0x93e   : > { %v3252_v1 = vpop.eup %3251  ;;  %v2058_v62 = vmul.f32 %v3250_v14, %v2026_v34  ;;  %v2079_v6 = vadd.f32 %v2900_v4, %v2069_v5 }
 0x93f   : > { %v2057_v7 = vmul.f32 %v3252_v1, %v2025_v28 }
 0x940   : > { %v2068_v15 = vmul.f32 %v2899_v2, %v2058_v62  ;;  %v3737_v12 = vmul.f32 %v3734_v8, %v2079_v6 }
 0x941   : > { %v3254_v58 = vpop.eup %3253  ;;  %v2067_v60 = vmul.f32 %v2899_v2, %v2057_v7 }
 0x942   : > { %v2078_v16 = vadd.f32 %v2900_v4, %v2068_v15  ;;  %v2941_v18 = vpack.c.bf16 %v3737_v12, %v3737_v12  ;;  %v2056_v19 = vmul.f32 %v3254_v58, %v2024_v33 }
 0x943   : > { %v2077_v54 = vadd.f32 %v2900_v4, %v2067_v60 }
 0x944   : > { %v3742_v20 = vmul.f32 %v3722_v48, %v2078_v16  ;;  %v2145_v21 = vshrl.u32 %v2941_v18, 16  ;;  %v2066_v22 = vmul.f32 %v2899_v2, %v2056_v19  ;;  %v2148_v34 = vshll.u32 %v2941_v18, 16  ;;  %v3210_v16 = vld [vmem:[%s3513_s29] sm:$0xff]  }
 0x945   : > { %v3745_v9 = vmul.f32 %v3720_v47, %v2077_v54 }
 0x946   : > { %v2940_v23 = vpack.c.bf16 %v3742_v20, %v3742_v20  ;;  %v2147_v10 = vrot.slane %v2145_v21, 7  ;;  %v2076_v13 = vadd.f32 %v2900_v4, %v2066_v22  ;;  %v3209_v4 = vld [vmem:[%s3513_s29 + $0x8] sm:$0xff]   ;;  %s3321_s29 = smov 32  }
 0x947   : > { %v2939_v25 = vpack.c.bf16 %v3745_v9, %v3745_v9  ;;  %3112 = vmatprep.subr.bf16.mxu1 %v3209_v4 }
 0x948   : > { %v2137_v27 = vshrl.u32 %v2940_v23, 16  ;;  %v2152_v28 = vrot.slane %v2147_v10, 4  ;;  %v3759_v30 = vmul.f32 %v3749_v24, %v2076_v13  ;;  %v2140_v33 = vshll.u32 %v2940_v23, 16  ;;  %3113 = vmatpush3.bf16.msra.mxu1 %v3209_v4 }
 0x949   : > { %v2128_v29 = vshrl.u32 %v2939_v25, 16  ;;  %v2150_v43 = vor.u32 %v2148_v34, %v2147_v10  ;;  %v2131_v17 = vshll.u32 %v2939_v25, 16  ;;  %3114 = vmatprep.subr.bf16.mxu1 %v3210_v16 }
 0x94a   : > { %v2139_v32 = vrot.slane %v2137_v27, 7  ;;  %v2177_v35 = vsel %vm3754_vm9, %v2152_v28, %v2176_v11  ;;  %v2938_v39 = vpack.c.bf16 %v3759_v30, %v3759_v30 }
 0x94b   : > { %v2130_v36 = vrot.slane %v2128_v29, 7  ;;  %2178 = vst [vmem:[#allocation2 + $0x14] sm:$0x1] %v2177_v35 }
 0x94c   : > { %v2142_v40 = vor.u32 %v2140_v33, %v2139_v32  ;;  %v2143_v41 = vrot.slane %v2139_v32, 4  ;;  %v2120_v45 = vshrl.u32 %v2938_v39, 16  ;;  %v2123_v52 = vshll.u32 %v2938_v39, 16  ;;  %3115 = vmatpush3.bf16.msra.mxu1 %v3210_v16 }
 0x94d   : > { %v2135_v44 = vrot.slane %v2130_v36, 4  ;;  %v2133_v57 = vor.u32 %v2131_v17, %v2130_v36  ;;  %v3214_v17 = vld [vmem:[%s3508_s5] sm:$0xff]  }
 0x94e   : > { %v2151_v46 = vsel %vm3762_vm12, %v2143_v41, %v2150_v43  ;;  %v2173_v49 = vsel %vm3769_vm13, %v2142_v40, %v2172_v38  ;;  %v2122_v51 = vrot.slane %v2120_v45, 7 }
 0x94f   : > { %v2170_v50 = vsel %vm3754_vm9, %v2135_v44, %v2169_v42  ;;  %2175 = vst.msk [vmem:[#allocation2 + $0x10] sm:$0xf] %vm2159_vm10, %v2151_v46  ;;  %2174 = vst [vmem:[#allocation2 + $0xc] sm:$0xf] %v2173_v49  ;;  %v3212_v46 = vld [vmem:[%s3508_s5 + $0x10] sm:$0xff]   ;;  %v3213_v49 = vld [vmem:[%s3508_s5 + $0x8] sm:$0xff]  }
 0x950   : > { %2171 = vst [vmem:[#allocation2 + $0x8] sm:$0x1] %v2170_v50  ;;  %v2125_v55 = vor.u32 %v2123_v52, %v2122_v51  ;;  %v2126_v56 = vrot.slane %v2122_v51, 4  ;;  %3122 = vmatprep.subr.bf16.mxu0 %v3212_v46  ;;  %v2911_v52 = vld [vmem:[%s3943_s2] ss:$0 sm:$0xff] }
 0x951   : > { %3123 = vmatpush3.bf16.msra.mxu0 %v3212_v46 }
 0x952   : > { %v2134_v59 = vsel %vm3762_vm12, %v2126_v56, %v2133_v57  ;;  %v2163_v61 = vsel %vm3769_vm13, %v2125_v55, %v2162_v53  ;;  %v3203_v5 = vld [vmem:[#allocation2 + $0x14] ss:$0 sps:$4 sm:$0x11]   ;;  %3124 = vmatprep.subr.bf16.mxu0 %v3213_v49 }
 0x953   : > { %2164 = vst [vmem:[#allocation2] sm:$0xf] %v2163_v61  ;;  %2166 = vst.msk [vmem:[#allocation2 + $0x4] sm:$0xf] %vm2159_vm10, %v2134_v59  ;;  %v2224_v18 = vshll.u32 %v3203_v5, 16  ;;  %v2243_v36 = vrot.slane %v3203_v5, 1 }
 0x955   : > { %v2226_v11 = vrot.slane %v2224_v18, 1  ;;  %3125 = vmatpush3.bf16.msra.mxu0 %v3213_v49 }
 0x956   : > { %v2181_v0 = vld [vmem:[#allocation2 + $0xc] sm:$0xf]  ;;  %v2182_v2 = vld [vmem:[#allocation2 + $0x10] sm:$0xf]  ;;  %3126 = vmatprep.subr.bf16.mxu0 %v3214_v17 }
 0x957   : > { %v2906_v3 = vcombine.low %v2181_v0, %v2182_v2  ;;  %v3199_v1 = vld [vmem:[#allocation2 + $0x8] ss:$0 sps:$4 sm:$0x11]   ;;  %v2186_v25 = vld [vmem:[#allocation2 + $0xc] sm:$0xe] }
 0x958   : > { %v2240_v54 = vrot.slane %v3199_v1, 1  ;;  %v2212_v28 = vshll.u32 %v3199_v1, 16  ;;  %v2910_v32 = vcombine.low %v2186_v25, %v2182_v2  ;;  %v2920_v1 = vld [vmem:[%s917_s7] ss:$0 sm:$0xff] }
 0x959   : > { %v2219_v14 = vshll.u32 %v2906_v3, 16  ;;  %v2217_v21 = vshrl.u32 %v2906_v3, 16  ;;  %3127 = vmatpush3.bf16.msra.mxu0 %v3214_v17 }
 0x95a   : > { %v2179_v62 = vld [vmem:[#allocation2] sm:$0xf]  ;;  %v2180_v6 = vld [vmem:[#allocation2 + $0x4] sm:$0xf]  ;;  %v2214_v33 = vrot.slane %v2212_v28, 1  ;;  %v2242_v35 = vrot.slane %v2910_v32, 1 }
 0x95b   : > { %v2185_v7 = vld [vmem:[#allocation2] sm:$0xe]  ;;  %v2905_v58 = vcombine.low %v2179_v62, %v2180_v6  ;;  %v2221_v60 = vrot.slane %v2219_v14, 1 }
 0x95c   : > { %v2909_v15 = vcombine.low %v2185_v7, %v2180_v6  ;;  %v2244_v37 = vsel %vm2238_vm14, %v2242_v35, %v2243_v36 }
 0x95d   : > { %v2207_v22 = vshll.u32 %v2905_v58, 16  ;;  %v2222_v10 = vor.u32 %v2221_v60, %v2217_v21  ;;  %v2205_v27 = vshrl.u32 %v2905_v58, 16 }
 0x95e   : > { %v2239_v19 = vrot.slane %v2909_v15, 1 }
 0x95f   : > { %v2209_v13 = vrot.slane %v2207_v22, 1  ;;  %v2227_v29 = vsel %vm2203_vm15, %v2222_v10, %v2226_v11 }
 0x960   : > { %v2241_v23 = vsel %vm2238_vm14, %v2239_v19, %v2240_v54 }
 0x961   : > { %2245 = vrot.lane.b32.xlu1 %v2241_v23, %s3320_s9  ;;  %v2210_v31 = vor.u32 %v2209_v13, %v2205_v27 }
 0x963   : > { %v2215_v34 = vsel %vm2203_vm15, %v2210_v31, %v2214_v33 }
 0x965   : > { %2230 = vrot.lane.b32.xlu1 %v2227_v29, %s3321_s29 }
 0x969   : > { %2228 = vrot.lane.b32.xlu1 %v2215_v34, %s3321_s29 }
 0x96d   : > { %2247 = vrot.lane.b32.xlu1 %v2244_v37, %s3320_s9 }
 0x9d3   : > { %v2246_v38 = vpop.permute.xlu1 %2245 }
 0x9d7   : > { %v2231_v39 = vpop.permute.xlu1 %2230 }
 0x9d8   : > { %v2252_v43 = vsel %vm982_vm3, %v2906_v3, %v2231_v39 }
 0x9db   : > { %v2229_v40 = vpop.permute.xlu1 %2228 }
 0x9dc   : > { %v2250_v41 = vsel %vm982_vm3, %v2905_v58, %v2229_v40 }
 0x9dd   : > { %v2255_v42 = vsel %vm2253_vm0, %v2250_v41, %v2246_v38 }
 0x9de   : > { %3116 = vmatprep.mubr.msk.bf16.mxu1 %vm2313_vm1, %v2255_v42 }
 0x9df   : > { %v2248_v44 = vpop.permute.xlu1 %2247 }
 0x9e0   : > { %v2257_v45 = vsel %vm2253_vm0, %v2252_v43, %v2248_v44 }
 0x9e1   : > { %3117 = vmatmul.mubr.msk.bf16.vlgmr.msra.gmra.mxu1 %vm2313_vm1, %v2257_v45 }
 0xaa1   : > { %v3118_v50 = vpop.f32.mrf.mxu1 }
 0xaa2   : > { %v2361_v57 = vadd.f32 %v3118_v50, %v2911_v52 }
 0xaa3   : > { %v2352_v51 = vpop.f32.mrf.mxu1 }
 0xaa4   : > { %v2353_v55 = vadd.f32 %v2911_v52, %v2352_v51  ;;  %v2369_v3 = vmax.f32 %v2361_v57, 0.0 }
 0xaa5   : > { %v3119_v53 = vpop.f32.mrf.mxu1 }
 0xaa6   : > { %v2364_v56 = vadd.f32 %v3119_v53, %v2911_v52  ;;  %v2367_v0 = vmax.f32 %v2353_v55, 0.0 }
 0xaa7   : > { %v2355_v59 = vpop.f32.mrf.mxu1 }
 0xaa8   : > { %v2356_v61 = vadd.f32 %v2911_v52, %v2355_v59  ;;  %v2370_v63 = vmax.f32 %v2364_v56, 0.0  ;;  %v2927_v56 = vld [vmem:[%s920_s24] ss:$0 sm:$0xff]  ;;  %s3945_s24 = sadd.s32 4294967295, %s3944_s0  }
 0xaa9   : > { %v2928_v59 = vld [vmem:[%s923_s4] ss:$0 sm:$0xff]  ;;  %s3322_s4 = smov [#allocation3]   ;;  %p3841_p6 = scmp.eq.s32.totalorder %s3945_s24, 1 }
 0xaaa   : > { %v2368_v2 = vmax.f32 %v2356_v61, 0.0  ;;  %v2372_v5 = vpack.c.bf16 %v2370_v63, %v2369_v3  ;;  %s2563_s22 = sshll.u32 %s3322_s4, 4  ;;  %s2564_s22 = int_to_ptr.vmem [resolvable:$true] %s2563_s22 }
 0xaab   : > { %s3263_s19 = scalar_lea.vmem %s2564_s22, 512  ;;  %p3270_p10 = scmp.lt.s32.totalorder %s2564_s22, %s2564_s22 }
 0xaac   : > { %v2371_v4 = vpack.c.bf16 %v2368_v2, %v2367_v0  ;;  %p3264_p7 = scmp.ne.s32.totalorder %s2564_s22, %s3263_s19  ;;  %p3271_p11 = scmp.lt.s32.totalorder %s3263_s19, %s3263_s19 }
 0xaae   : > { %3128 = vmatprep.mubr.msk.bf16.mxu0 %vm2253_vm0, %v2371_v4  ;;  %p3265_p8 = pnand %p3264_p7, %p3841_p6  ;;  %p3272_p12 = por %p3271_p11, %p3270_p10 }
 0xaaf   : > { %3129 = vmatmul.mubr.msk.bf16.vlgmr.msra.gmra.mxu0 %vm2253_vm0, %v2372_v5 }
 0xab0   : > { %p3266_p9 = pneg %p3265_p8 }
 0xab2   : > { %p3273_p13 = pnand %p3272_p12, %p3266_p9 }
 0xb6f   : > { %v3130_v14 = vpop.f32.mrf.mxu0 }
 0xb70   : > { %v2461_v16 = vadd.f32 %v3130_v14, %v2920_v1 }
 0xb71   : > { %v2452_v62 = vpop.f32.mrf.mxu0 }
 0xb72   : > { %v2453_v6 = vadd.f32 %v2920_v1, %v2452_v62  ;;  %v2469_v10 = vadd.f32 %v2461_v16, %v3742_v20 }
 0xb73   : > { %v3131_v7 = vpop.f32.mrf.mxu0 }
 0xb74   : > { %v2464_v15 = vadd.f32 %v3131_v7, %v2920_v1  ;;  %v2467_v58 = vadd.f32 %v2453_v6, %v3759_v30  ;;  %v2479_v30 = vsel %vm982_vm3, %v2469_v10, 0.0 }
 0xb75   : > { %v2455_v60 = vpop.f32.mrf.mxu0 }
 0xb76   : > { %v2456_v18 = vadd.f32 %v2920_v1, %v2455_v60  ;;  %v2473_v19 = vsel %vm982_vm3, %v2467_v58, 0.0  ;;  %v2470_v54 = vadd.f32 %v2464_v15, %v3737_v12 }
 0xb77   : > { %2474 = vadd.xlane.f32.xlu1 %v2473_v19 }
 0xb78   : > { %v2468_v21 = vadd.f32 %v2456_v18, %v3745_v9  ;;  %v2482_v23 = vsel %vm982_vm3, %v2470_v54, 0.0 }
 0xb7a   : > { %v2476_v22 = vsel %vm982_vm3, %v2468_v21, 0.0 }
 0xb7b   : > { %2477 = vadd.xlane.f32.xlu0 %v2476_v22  ;;  %2483 = vadd.xlane.f32.xlu1 %v2482_v23 }
 0xb7f   : > { %2480 = vadd.xlane.f32.xlu0 %v2479_v30 }
 0xc00   : > { %v2475_v13 = vpop.xlane.xlu1 %2474 }
 0xc01   : > { %v2485_v25 = vmul.f32 0.03125, %v2475_v13 }
 0xc03   : > { %v2489_v26 = vsub.f32 %v2467_v58, %v2485_v25 }
 0xc04   : > { %v2478_v11 = vpop.xlane.xlu0 %2477  ;;  %v2484_v27 = vpop.xlane.xlu1 %2483 }
 0xc05   : > { %v2486_v12 = vmul.f32 0.03125, %v2478_v11  ;;  %v2488_v28 = vmul.f32 0.03125, %v2484_v27  ;;  %v2493_v29 = vmul.f32 %v2489_v26, %v2489_v26 }
 0xc07   : > { %v2490_v9 = vsub.f32 %v2468_v21, %v2486_v12  ;;  %v2492_v31 = vsub.f32 %v2470_v54, %v2488_v28  ;;  %v2497_v32 = vsel %vm982_vm3, %v2493_v29, 0.0 }
 0xc08   : > { %v2481_v33 = vpop.xlane.xlu0 %2480  ;;  %2498 = vadd.xlane.f32.xlu0 %v2497_v32 }
 0xc09   : > { %v2487_v20 = vmul.f32 0.03125, %v2481_v33  ;;  %v2494_v34 = vmul.f32 %v2490_v9, %v2490_v9  ;;  %v2496_v37 = vmul.f32 %v2492_v31, %v2492_v31 }
 0xc0b   : > { %v2491_v35 = vsub.f32 %v2469_v10, %v2487_v20  ;;  %v2500_v36 = vsel %vm982_vm3, %v2494_v34, 0.0  ;;  %v2506_v40 = vsel %vm982_vm3, %v2496_v37, 0.0 }
 0xc0c   : > { %2501 = vadd.xlane.f32.xlu1 %v2500_v36 }
 0xc0d   : > { %v2495_v38 = vmul.f32 %v2491_v35, %v2491_v35 }
 0xc0f   : > { %v2503_v39 = vsel %vm982_vm3, %v2495_v38, 0.0 }
 0xc10   : > { %2504 = vadd.xlane.f32.xlu0 %v2503_v39  ;;  %2507 = vadd.xlane.f32.xlu1 %v2506_v40 }
 0xc91   : > { %v2499_v41 = vpop.xlane.xlu0 %2498 }
 0xc92   : > { %v2509_v42 = vmul.f32 0.03125, %v2499_v41 }
 0xc94   : > { %v2513_v43 = vadd.f32 1e-05, %v2509_v42 }
 0xc95   : > { %v2502_v44 = vpop.xlane.xlu1 %2501 }
 0xc96   : > { %3255 = vrsqrt.f32 %v2513_v43  ;;  %v2510_v45 = vmul.f32 0.03125, %v2502_v44 }
 0xc98   : > { %v2514_v46 = vadd.f32 1e-05, %v2510_v45 }
 0xc99   : > { %v2505_v49 = vpop.xlane.xlu0 %2504  ;;  %v2508_v17 = vpop.xlane.xlu1 %2507 }
 0xc9a   : > { %3257 = vrsqrt.f32 %v2514_v46  ;;  %v2511_v50 = vmul.f32 0.03125, %v2505_v49  ;;  %v2512_v51 = vmul.f32 0.03125, %v2508_v17 }
 0xc9c   : > { %v2515_v52 = vadd.f32 1e-05, %v2511_v50  ;;  %v2516_v53 = vadd.f32 1e-05, %v2512_v51 }
 0xc9e   : > { %3259 = vrsqrt.f32 %v2515_v52 }
 0xc9f   : > { %3261 = vrsqrt.f32 %v2516_v53 }
 0xca3   : > { %v3256_v55 = vpop.eup %3255 }
 0xca4   : > { %v2521_v57 = vmul.f32 %v3256_v55, %v2489_v26 }
 0xca6   : > { %v2531_v61 = vmul.f32 %v2927_v56, %v2521_v57 }
 0xca7   : > { %v3258_v63 = vpop.eup %3257 }
 0xca8   : > { %v2541_v0 = vadd.f32 %v2928_v59, %v2531_v61  ;;  %v2522_v2 = vmul.f32 %v3258_v63, %v2490_v9 }
 0xcaa   : > { %v2532_v3 = vmul.f32 %v2927_v56, %v2522_v2  ;;  %v2545_v4 = vmul.f32 %v2541_v0, %v3749_v24 }
 0xcab   : > { %v3260_v5 = vpop.eup %3259 }
 0xcac   : > { %v3262_v14 = vpop.eup %3261  ;;  %v2542_v1 = vadd.f32 %v2928_v59, %v2532_v3  ;;  %v2523_v62 = vmul.f32 %v3260_v5, %v2491_v35  ;;  %2549 = vst.msk [vmem:[#allocation3] sm:$0xff] %vm982_vm3, %v2545_v4 }
 0xcad   : > { %v2524_v6 = vmul.f32 %v3262_v14, %v2492_v31 }
 0xcae   : > { %v2533_v7 = vmul.f32 %v2927_v56, %v2523_v62  ;;  %v2546_v15 = vmul.f32 %v2542_v1, %v3720_v47 }
 0xcaf   : > { %v2534_v58 = vmul.f32 %v2927_v56, %v2524_v6 }
 0xcb0   : > { %v2543_v60 = vadd.f32 %v2928_v59, %v2533_v7  ;;  %2550 = vst.msk [vmem:[#allocation3 + $0x8] sm:$0xff] %vm982_vm3, %v2546_v15 }
 0xcb1   : > { %v2544_v16 = vadd.f32 %v2928_v59, %v2534_v58 }
 0xcb2   : > { %v2547_v24 = vmul.f32 %v2543_v60, %v3722_v48 }
 0xcb3   : > { %v2548_v18 = vmul.f32 %v2544_v16, %v3734_v8 }
 0xcb4   : > { %2551 = vst.msk [vmem:[#allocation3 + $0x10] sm:$0xff] %vm982_vm3, %v2547_v24 }
 0xcb5   : > { %2552 = vst.msk [vmem:[#allocation3 + $0x18] sm:$0xff] %vm982_vm3, %v2548_v18 }
 0xcb6   : > { %3276 = shalt.err (!%p3273_p13)
}
 0xcb7   : > { %s3323_s27 = smov 128   ;;  %s3324_s25 = smov 8  }
 0xcb8   : > { %s3947_s28 = sld [smem:[#allocation24_spill]] }
 0xcbe   : > { %3134 = dma.vmem_to_hbm [thread:$0]  (%p3841_p6), %s2564_s22, 512, %s3947_s28, [#allocation4], %s3323_s27, %s3323_s27, %s3324_s25  }
 0xcbf   : > { %3300 = dma.done.wait (%p3841_p6), [#allocation4], 512  }
 0xcc0   : > { %3302 = vsyncadd (%p3841_p6), [#allocation4], 4294966784 }
 0xcc1 PF: > { %s3948_s21 = sld [smem:[#allocation8_spill]] }
 0xcc2   : > { %s3949_s0 = sld [smem:[#allocation7_spill]] }
 0xcc3   : > { %s3950_s30 = sld [smem:[#allocation9_spill]] }
 0xcc7   : > { %s30_s20 = sadd.s32 1, %s3948_s21  }
 0xcc8   : > { %p27_p0 = scmp.ge.s32.totalorder %s30_s20, 4  }
 0xcca   :  { %29 = sbr.rel (!%p27_p0) target bundleno = 14 (0xe), region = 188 }
 0xccf   :  { %2579 = vsyncpa [#allocation4], 1 }
 0xcd0   :  { %2581 = vsyncpa [#allocation4 + $0x1], 1 }

</bundles_post_ra>
